<compile_context>
chip_gen: v7x
topology: tpu7x:2x2x1
jax: 0.10.0
libtpu: 0.0.40
codegen_flags: <defaults>
</compile_context>

<pallas_src>
import functools

import jax
import jax.numpy as jnp
from jax.experimental import pallas as pl
from jax.experimental.pallas import tpu as pltpu


# ---------------------------------------------------------------------------
# Fused Pallas kernel: prob_embed MLP + dir_diff, permute folded into layout
# ---------------------------------------------------------------------------
def _agg_fused_kernel(rf_ref, side_ref, qd_ref,
                      w1rf_ref, w1hp_ref, w1vis_ref, b1_ref, w2_ref, b2_ref,
                      pe_ref, dd_ref, *, rfn):
    """Per row tile:
         for every view r (static unrolled loop, rfn is small):
           h  = relu(bf16(rf_r) @ bf16(w1[:32]) + hp_r*2*w1[32] + vis_r*2*w1[33]
                     + (b1 - w1[32] - w1[33]))          # (v-0.5)*2 folded away
           y  = bf16(h) @ bf16(w2) + b2                 # f32 accumulation
           dd = [dir_r - que_dir, <dir_r, que_dir>]
       and store all views lane-concatenated: pe (tile, rfn*dim),
       dd (tile, rfn*4)."""
    # weights / biases loaded once (reused across the unrolled rfn loop)
    w1rf = w1rf_ref[...]                       # (rf_dim, dim) bf16
    w1hp = w1hp_ref[...]                       # (1, dim) f32   (already *2)
    w1vis = w1vis_ref[...]                     # (1, dim) f32   (already *2)
    b1 = b1_ref[...]                           # (1, dim) f32   (folded bias)
    w2 = w2_ref[...]                           # (dim, dim) bf16
    b2 = b2_ref[...]                           # (1, dim) f32
    qd = qd_ref[...].astype(jnp.float32)       # (tile, 3)

    pe_parts = []
    dd_parts = []
    for r in range(rfn):                       # rfn is small (3..8): unrolled
        rf = rf_ref[r].astype(jnp.bfloat16)    # (tile, rf_dim)
        side = side_ref[r]                     # (tile, 5) = [hit_prob, vis, dir]
        hp = side[:, 0:1].astype(jnp.float32)  # (tile, 1)
        vi = side[:, 1:2].astype(jnp.float32)  # (tile, 1)
        pd = side[:, 2:5].astype(jnp.float32)  # (tile, 3)

        h = jnp.dot(rf, w1rf, preferred_element_type=jnp.float32)
        h = h + hp * w1hp + vi * w1vis + b1
        h = jnp.maximum(h, 0.0).astype(jnp.bfloat16)
        y = jnp.dot(h, w2, preferred_element_type=jnp.float32) + b2
        pe_parts.append(y)

        dot = jnp.sum(pd * qd, axis=-1, keepdims=True)   # (tile, 1)
        dd_parts.append(pd - qd)
        dd_parts.append(dot)

    # single (near) lane-dense store per output stream
    pe_ref[...] = jnp.concatenate(pe_parts, axis=-1).astype(pe_ref.dtype)
    dd_ref[...] = jnp.concatenate(dd_parts, axis=-1).astype(dd_ref.dtype)


# ---------------------------------------------------------------------------
# Wrapper
# ---------------------------------------------------------------------------
_TILE_MAX = 2048            # rows per grid step (upper bound)
_VMEM_BUDGET = 20 << 20     # bytes for streamed (double-buffered) blocks
_VMEM_LIMIT = 32 << 20      # scoped VMEM limit (fits v5e/v6e/v7x comfortably)


def _round_up(x, m):
    return (x + m - 1) // m * m


def _pick_tile(m, rfn, dim):
    """VMEM-budgeted row-tile size.  Every <128-lane f32 block is lane-padded
    to 128 in VMEM and double-buffered by the pipeline, so budget per row:"""
    per_row = 2 * 4 * (
        rfn * 128                        # ray_feats block
        + rfn * 128                      # packed side block (hp, vis, dir)
        + 128                            # que_dir block
        + _round_up(rfn * dim, 128)      # prob_embedding out block
        + _round_up(rfn * 4, 128))       # dir_diff out block
    budget_rows = (_VMEM_BUDGET // per_row) // 16 * 16
    tile = max(16, min(_TILE_MAX, budget_rows))
    tile = min(tile, _round_up(m, 8))
    # v7x megacore: keep >= 2 blocks along the (only) parallel grid axis
    if m > 256 and (m + tile - 1) // tile < 2:
        tile = _round_up((m + 1) // 2, 16)
    return tile


def aggregation_hot_path(ray_feats, hit_prob, vis, prj_dir, que_dir,
                         w1, b1, w2, b2):
    """Inputs:
         ray_feats (rfn,qn,rn,dn,rf_dim), hit_prob/vis (rfn,qn,rn,dn,1),
         prj_dir (rfn,qn,rn,dn,3), que_dir (qn,rn,dn,3).
       Returns prob_embedding (M, rfn*dim) and dir_diff (M, rfn*4) with
       M = qn*rn*dn, already in the final (permuted) memory layout:
       a free contiguous reshape gives (qn*rn, dn, rfn, feat)."""
    rfn, qn, rn, dn, rf_dim = ray_feats.shape
    dim = w1.shape[1]
    m = qn * rn * dn

    # free (contiguous) reshapes; the only HBM prep pass is the tiny 5-wide
    # packing of the narrow side inputs (fewer DMA streams / VMEM buffers)
    rf = ray_feats.reshape(rfn, m, rf_dim)
    side = jnp.concatenate([hit_prob, vis, prj_dir], axis=-1).reshape(rfn, m, 5)
    qd = que_dir.reshape(m, 3)

    # fold (v - 0.5) * 2 = 2v - 1 of hit_prob/vis into the first layer
    w1rf = w1[:rf_dim].astype(jnp.bfloat16)                    # (rf_dim, dim)
    w1hp = (2.0 * w1[rf_dim:rf_dim + 1]).astype(jnp.float32)   # (1, dim)
    w1vis = (2.0 * w1[rf_dim + 1:rf_dim + 2]).astype(jnp.float32)
    b1eff = (b1 - w1[rf_dim] - w1[rf_dim + 1]).reshape(1, dim).astype(jnp.float32)
    w2b = w2.astype(jnp.bfloat16)
    b2r = b2.reshape(1, dim).astype(jnp.float32)

    tile = _pick_tile(m, rfn, dim)
    grid = ((m + tile - 1) // tile,)

    kernel = functools.partial(_agg_fused_kernel, rfn=rfn)

    pe, dd = pl.pallas_call(
        kernel,
        out_shape=(jax.ShapeDtypeStruct((m, rfn * dim), jnp.float32),
                   jax.ShapeDtypeStruct((m, rfn * 4), jnp.float32)),
        grid=grid,
        in_specs=[
            pl.BlockSpec((rfn, tile, rf_dim), lambda i: (0, i, 0)),  # ray_feats
            pl.BlockSpec((rfn, tile, 5), lambda i: (0, i, 0)),       # hp|vis|dir
            pl.BlockSpec((tile, 3), lambda i: (i, 0)),               # que_dir
            pl.BlockSpec((rf_dim, dim), lambda i: (0, 0)),           # w1[:32] bf16
            pl.BlockSpec((1, dim), lambda i: (0, 0)),                # 2*w1[32]
            pl.BlockSpec((1, dim), lambda i: (0, 0)),                # 2*w1[33]
            pl.BlockSpec((1, dim), lambda i: (0, 0)),                # folded b1
            pl.BlockSpec((dim, dim), lambda i: (0, 0)),              # w2 bf16
            pl.BlockSpec((1, dim), lambda i: (0, 0)),                # b2
        ],
        out_specs=(
            pl.BlockSpec((tile, rfn * dim), lambda i: (i, 0)),       # prob_embedding
            pl.BlockSpec((tile, rfn * 4), lambda i: (i, 0)),         # dir_diff
        ),
        compiler_params=pltpu.CompilerParams(
            dimension_semantics=("parallel",),
            vmem_limit_bytes=_VMEM_LIMIT),
    )(rf, side, qd, w1rf, w1hp, w1vis, b1eff, w2b, b2r)
    return pe, dd


# ---------------------------------------------------------------------------
# DefaultAggregationNet (forward semantics)
# ---------------------------------------------------------------------------
class DefaultAggregationNet:
    default_cfg = {"sample_num": 64, "neuray_dim": 32, "use_img_feats": False}

    def __init__(self, cfg, rf_dim=32, key=jax.random.PRNGKey(42)):
        self.cfg = {**self.default_cfg, **cfg}
        dim = self.cfg["neuray_dim"]
        self.rf_dim = rf_dim  # ray_feats feature dim (32 in the torch module)
        in_dim = 2 + rf_dim
        k1, k2, k3, k4 = jax.random.split(key, 4)
        # deterministic synthetic params for nn.Linear(2+32, dim) / nn.Linear(dim, dim)
        self.w1 = jax.random.normal(k1, (in_dim, dim), jnp.float32) * (1.0 / jnp.sqrt(in_dim))
        self.b1 = jax.random.normal(k2, (dim,), jnp.float32) * 0.01
        self.w2 = jax.random.normal(k3, (dim, dim), jnp.float32) * (1.0 / jnp.sqrt(dim))
        self.b2 = jax.random.normal(k4, (dim,), jnp.float32) * 0.01

    def __call__(self, prj_dict, que_pts, que_dir):
        prj_ray_feats = prj_dict["ray_feats"]   # rfn,qn,rn,dn,rf_dim
        prj_hit_prob = prj_dict["hit_prob"]     # rfn,qn,rn,dn,1
        prj_vis = prj_dict["vis"]               # rfn,qn,rn,dn,1
        prj_rgb = prj_dict["rgb"]               # rfn,qn,rn,dn,3
        prj_dir = prj_dict["dir"]               # rfn,qn,rn,dn,3
        rfn, qn, rn, dn, _ = prj_hit_prob.shape
        dim = self.cfg["neuray_dim"]

        # ---- fused Pallas hot path: prob_embed MLP + dir_diff, already in
        #      the final (qn*rn, dn, rfn, feat) memory layout --------------
        pe, dd = aggregation_hot_path(
            prj_ray_feats, prj_hit_prob, prj_vis, prj_dir, que_dir,
            self.w1, self.b1, self.w2, self.b2)     # (M, rfn*dim), (M, rfn*4)

        # free contiguous reshapes (no transpose pass through HBM)
        prob_embedding = pe.reshape(qn * rn, dn, rfn, dim)
        dir_diff = dd.reshape(qn * rn, dn, rfn, 4)

        # ---- remaining relayout glue (pure data movement, no compute) ------
        def to_agg_layout(x):  # (rfn,qn,rn,dn,f) -> (qn*rn, dn, rfn, f)
            f = x.shape[-1]
            return jnp.transpose(x.reshape(rfn, qn * rn, dn, f), (1, 2, 0, 3))

        valid_mask = to_agg_layout(prj_dict["mask"].astype(jnp.float32))
        prj_img_feats = to_agg_layout(
            jnp.concatenate([prj_rgb, prj_dict["img_feats"]], axis=-1))

        # TODO(synk): Insertnerf agg_impl is not provided -> return its prepared inputs.
        return prj_img_feats, prob_embedding, dir_diff, valid_mask


# ---------------------------------------------------------------------------
# Reference (plain JAX, torch semantics) for the Pallas hot paths
# ---------------------------------------------------------------------------
def _prob_embed_ref(pe_in, w1, b1, w2, b2, rf_dim):
    x = pe_in.astype(jnp.float32)
    x = x.at[:, rf_dim:].set((x[:, rf_dim:] - 0.5) * 2.0)
    h = jnp.maximum(x @ w1 + b1, 0.0)
    return h @ w2 + b2


if __name__ == "__main__":
    key = jax.random.PRNGKey(0)
    rfn, qn, rn, dn = 3, 2, 4, 8
    rf_dim, img_dim = 32, 16
    ks = jax.random.split(key, 8)

    prj_dict = {
        "ray_feats": jax.random.normal(ks[0], (rfn, qn, rn, dn, rf_dim), jnp.float32),
        "hit_prob": jax.random.uniform(ks[1], (rfn, qn, rn, dn, 1), jnp.float32),
        "vis": jax.random.uniform(ks[2], (rfn, qn, rn, dn, 1), jnp.float32),
        "rgb": jax.random.uniform(ks[3], (rfn, qn, rn, dn, 3), jnp.float32),
        "dir": jax.random.normal(ks[4], (rfn, qn, rn, dn, 3), jnp.float32),
        "mask": (jax.random.uniform(ks[5], (rfn, qn, rn, dn, 1)) > 0.3),
        "img_feats": jax.random.normal(ks[6], (rfn, qn, rn, dn, img_dim), jnp.float32),
    }
    que_pts = jax.random.normal(ks[7], (qn, rn, dn, 3), jnp.float32)
    que_dir = jax.random.normal(jax.random.PRNGKey(1), (qn, rn, dn, 3), jnp.float32)

    net = DefaultAggregationNet({"sample_num": dn, "neuray_dim": 32}, rf_dim=rf_dim)
    outs = net(prj_dict, que_pts, que_dir)
    outs = jax.block_until_ready(outs)

    # correctness check of the fused Pallas MLP against plain JAX f32 reference
    # (kernel uses bf16 MXU operands with f32 accumulation -> 5e-2 tolerance)
    n = rfn * qn * rn * dn
    pe_in = jnp.concatenate(
        [prj_dict["ray_feats"], prj_dict["hit_prob"], prj_dict["vis"]], axis=-1
    ).reshape(n, rf_dim + 2)
    ref = _prob_embed_ref(pe_in, net.w1, net.b1, net.w2, net.b2, rf_dim)
    ref = jnp.transpose(ref.reshape(rfn, qn * rn, dn, 32), (1, 2, 0, 3))
    assert outs[1].shape == ref.shape
    assert jnp.allclose(outs[1], ref, atol=5e-2, rtol=5e-2)

    # dir_diff check (exact f32 path)
    dd_ref = jnp.concatenate(
        [
            prj_dict["dir"] - que_dir[None],
            jnp.sum(prj_dict["dir"] * que_dir[None], -1, keepdims=True),
        ],
        -1,
    )
    dd_ref = jnp.transpose(dd_ref.reshape(rfn, qn * rn, dn, 4), (1, 2, 0, 3))
    assert outs[2].shape == dd_ref.shape
    assert jnp.allclose(outs[2], dd_ref, atol=1e-5, rtol=1e-5)

    print("KERNEL_OK")
</pallas_src>

<mosaic_0001>
module attributes {stable_mosaic.version = 11 : i64} {
  func.func @_agg_fused_kernel(%arg0: i32, %arg1: memref<3x64x32xf32, #tpu.memory_space<vmem>>, %arg2: memref<3x64x5xf32, #tpu.memory_space<vmem>>, %arg3: memref<64x3xf32, #tpu.memory_space<vmem>>, %arg4: memref<32x32xbf16, #tpu.memory_space<vmem>>, %arg5: memref<1x32xf32, #tpu.memory_space<vmem>>, %arg6: memref<1x32xf32, #tpu.memory_space<vmem>>, %arg7: memref<1x32xf32, #tpu.memory_space<vmem>>, %arg8: memref<32x32xbf16, #tpu.memory_space<vmem>>, %arg9: memref<1x32xf32, #tpu.memory_space<vmem>>, %arg10: memref<64x96xf32, #tpu.memory_space<vmem>>, %arg11: memref<64x12xf32, #tpu.memory_space<vmem>>) attributes {dimension_semantics = [#tpu.dimension_semantics<parallel>], iteration_bounds = array<i64: 1>, scalar_prefetch = 0 : i64, scratch_operands = 0 : i64, tpu.core_type = #tpu.core_type<tc>, window_params = [{transform_indices = @transform_0, window_bounds = array<i64: 3, 64, 32>}, {transform_indices = @transform_1, window_bounds = array<i64: 3, 64, 5>}, {transform_indices = @transform_2, window_bounds = array<i64: 64, 3>}, {pipeline_mode = #tpu.pipeline_mode<synchronous>, transform_indices = @transform_3, window_bounds = array<i64: 32, 32>}, {pipeline_mode = #tpu.pipeline_mode<synchronous>, transform_indices = @transform_4, window_bounds = array<i64: 1, 32>}, {pipeline_mode = #tpu.pipeline_mode<synchronous>, transform_indices = @transform_5, window_bounds = array<i64: 1, 32>}, {pipeline_mode = #tpu.pipeline_mode<synchronous>, transform_indices = @transform_6, window_bounds = array<i64: 1, 32>}, {pipeline_mode = #tpu.pipeline_mode<synchronous>, transform_indices = @transform_7, window_bounds = array<i64: 32, 32>}, {pipeline_mode = #tpu.pipeline_mode<synchronous>, transform_indices = @transform_8, window_bounds = array<i64: 1, 32>}, {transform_indices = @transform_9, window_bounds = array<i64: 64, 96>}, {transform_indices = @transform_10, window_bounds = array<i64: 64, 12>}]} {
    %c0 = arith.constant 0 : index
    %c0_0 = arith.constant 0 : index
    %0 = vector.load %arg4[%c0, %c0_0] : memref<32x32xbf16, #tpu.memory_space<vmem>>, vector<32x32xbf16>
    %c0_1 = arith.constant 0 : index
    %c0_2 = arith.constant 0 : index
    %1 = vector.load %arg5[%c0_1, %c0_2] : memref<1x32xf32, #tpu.memory_space<vmem>>, vector<1x32xf32>
    %c0_3 = arith.constant 0 : index
    %c0_4 = arith.constant 0 : index
    %2 = vector.load %arg6[%c0_3, %c0_4] : memref<1x32xf32, #tpu.memory_space<vmem>>, vector<1x32xf32>
    %c0_5 = arith.constant 0 : index
    %c0_6 = arith.constant 0 : index
    %3 = vector.load %arg7[%c0_5, %c0_6] : memref<1x32xf32, #tpu.memory_space<vmem>>, vector<1x32xf32>
    %c0_7 = arith.constant 0 : index
    %c0_8 = arith.constant 0 : index
    %4 = vector.load %arg8[%c0_7, %c0_8] : memref<32x32xbf16, #tpu.memory_space<vmem>>, vector<32x32xbf16>
    %c0_9 = arith.constant 0 : index
    %c0_10 = arith.constant 0 : index
    %5 = vector.load %arg9[%c0_9, %c0_10] : memref<1x32xf32, #tpu.memory_space<vmem>>, vector<1x32xf32>
    %c0_11 = arith.constant 0 : index
    %c0_12 = arith.constant 0 : index
    %6 = vector.load %arg3[%c0_11, %c0_12] : memref<64x3xf32, #tpu.memory_space<vmem>>, vector<64x3xf32>
    %c0_13 = arith.constant 0 : index
    %c0_14 = arith.constant 0 : index
    %c0_15 = arith.constant 0 : index
    %7 = vector.load %arg1[%c0_13, %c0_14, %c0_15] : memref<3x64x32xf32, #tpu.memory_space<vmem>>, vector<1x64x32xf32>
    %8 = vector.shape_cast %7 : vector<1x64x32xf32> to vector<64x32xf32>
    %9 = arith.truncf %8 : vector<64x32xf32> to vector<64x32xbf16>
    %c0_16 = arith.constant 0 : index
    %c0_17 = arith.constant 0 : index
    %c0_18 = arith.constant 0 : index
    %10 = vector.load %arg2[%c0_16, %c0_17, %c0_18] : memref<3x64x5xf32, #tpu.memory_space<vmem>>, vector<1x64x5xf32>
    %11 = vector.shape_cast %10 : vector<1x64x5xf32> to vector<64x5xf32>
    %12 = vector.extract_strided_slice %11 {offsets = [0, 0], sizes = [64, 1], strides = [1, 1]} : vector<64x5xf32> to vector<64x1xf32>
    %13 = vector.extract_strided_slice %11 {offsets = [0, 1], sizes = [64, 1], strides = [1, 1]} : vector<64x5xf32> to vector<64x1xf32>
    %14 = vector.extract_strided_slice %11 {offsets = [0, 2], sizes = [64, 3], strides = [1, 1]} : vector<64x5xf32> to vector<64x3xf32>
    %cst = arith.constant dense<0.000000e+00> : vector<64x32xf32>
    %15 = tpu.matmul %9, %0, %cst {dimension_numbers = #tpu.dot_dimension_numbers<[1], [0], [0], [1], [0, 0, 1, 1], [], []>} : vector<64x32xbf16>, vector<32x32xbf16>, vector<64x32xf32> -> vector<64x32xf32>
    %16 = vector.broadcast %12 : vector<64x1xf32> to vector<64x32xf32>
    %17 = vector.broadcast %1 : vector<1x32xf32> to vector<64x32xf32>
    %18 = arith.mulf %16, %17 : vector<64x32xf32>
    %19 = arith.addf %15, %18 : vector<64x32xf32>
    %20 = vector.broadcast %13 : vector<64x1xf32> to vector<64x32xf32>
    %21 = vector.broadcast %2 : vector<1x32xf32> to vector<64x32xf32>
    %22 = arith.mulf %20, %21 : vector<64x32xf32>
    %23 = arith.addf %19, %22 : vector<64x32xf32>
    %24 = vector.broadcast %3 : vector<1x32xf32> to vector<64x32xf32>
    %25 = arith.addf %23, %24 : vector<64x32xf32>
    %cst_19 = arith.constant 0.000000e+00 : f32
    %26 = vector.broadcast %cst_19 : f32 to vector<64x32xf32>
    %27 = arith.maximumf %25, %26 : vector<64x32xf32>
    %28 = arith.truncf %27 : vector<64x32xf32> to vector<64x32xbf16>
    %cst_20 = arith.constant dense<0.000000e+00> : vector<64x32xf32>
    %29 = tpu.matmul %28, %4, %cst_20 {dimension_numbers = #tpu.dot_dimension_numbers<[1], [0], [0], [1], [0, 0, 1, 1], [], []>} : vector<64x32xbf16>, vector<32x32xbf16>, vector<64x32xf32> -> vector<64x32xf32>
    %30 = vector.broadcast %5 : vector<1x32xf32> to vector<64x32xf32>
    %31 = arith.addf %29, %30 : vector<64x32xf32>
    %32 = arith.mulf %14, %6 : vector<64x3xf32>
    %cst_21 = arith.constant dense<0.000000e+00> : vector<64xf32>
    %33 = vector.multi_reduction <add>, %32, %cst_21 [1] : vector<64x3xf32> to vector<64xf32>
    %34 = vector.shape_cast %33 : vector<64xf32> to vector<64x1xf32>
    %35 = arith.subf %14, %6 : vector<64x3xf32>
    %c1 = arith.constant 1 : index
    %c0_22 = arith.constant 0 : index
    %c0_23 = arith.constant 0 : index
    %36 = vector.load %arg1[%c1, %c0_22, %c0_23] : memref<3x64x32xf32, #tpu.memory_space<vmem>>, vector<1x64x32xf32>
    %37 = vector.shape_cast %36 : vector<1x64x32xf32> to vector<64x32xf32>
    %38 = arith.truncf %37 : vector<64x32xf32> to vector<64x32xbf16>
    %c1_24 = arith.constant 1 : index
    %c0_25 = arith.constant 0 : index
    %c0_26 = arith.constant 0 : index
    %39 = vector.load %arg2[%c1_24, %c0_25, %c0_26] : memref<3x64x5xf32, #tpu.memory_space<vmem>>, vector<1x64x5xf32>
    %40 = vector.shape_cast %39 : vector<1x64x5xf32> to vector<64x5xf32>
    %41 = vector.extract_strided_slice %40 {offsets = [0, 0], sizes = [64, 1], strides = [1, 1]} : vector<64x5xf32> to vector<64x1xf32>
    %42 = vector.extract_strided_slice %40 {offsets = [0, 1], sizes = [64, 1], strides = [1, 1]} : vector<64x5xf32> to vector<64x1xf32>
    %43 = vector.extract_strided_slice %40 {offsets = [0, 2], sizes = [64, 3], strides = [1, 1]} : vector<64x5xf32> to vector<64x3xf32>
    %cst_27 = arith.constant dense<0.000000e+00> : vector<64x32xf32>
    %44 = tpu.matmul %38, %0, %cst_27 {dimension_numbers = #tpu.dot_dimension_numbers<[1], [0], [0], [1], [0, 0, 1, 1], [], []>} : vector<64x32xbf16>, vector<32x32xbf16>, vector<64x32xf32> -> vector<64x32xf32>
    %45 = vector.broadcast %41 : vector<64x1xf32> to vector<64x32xf32>
    %46 = vector.broadcast %1 : vector<1x32xf32> to vector<64x32xf32>
    %47 = arith.mulf %45, %46 : vector<64x32xf32>
    %48 = arith.addf %44, %47 : vector<64x32xf32>
    %49 = vector.broadcast %42 : vector<64x1xf32> to vector<64x32xf32>
    %50 = vector.broadcast %2 : vector<1x32xf32> to vector<64x32xf32>
    %51 = arith.mulf %49, %50 : vector<64x32xf32>
    %52 = arith.addf %48, %51 : vector<64x32xf32>
    %53 = vector.broadcast %3 : vector<1x32xf32> to vector<64x32xf32>
    %54 = arith.addf %52, %53 : vector<64x32xf32>
    %cst_28 = arith.constant 0.000000e+00 : f32
    %55 = vector.broadcast %cst_28 : f32 to vector<64x32xf32>
    %56 = arith.maximumf %54, %55 : vector<64x32xf32>
    %57 = arith.truncf %56 : vector<64x32xf32> to vector<64x32xbf16>
    %cst_29 = arith.constant dense<0.000000e+00> : vector<64x32xf32>
    %58 = tpu.matmul %57, %4, %cst_29 {dimension_numbers = #tpu.dot_dimension_numbers<[1], [0], [0], [1], [0, 0, 1, 1], [], []>} : vector<64x32xbf16>, vector<32x32xbf16>, vector<64x32xf32> -> vector<64x32xf32>
    %59 = vector.broadcast %5 : vector<1x32xf32> to vector<64x32xf32>
    %60 = arith.addf %58, %59 : vector<64x32xf32>
    %61 = arith.mulf %43, %6 : vector<64x3xf32>
    %cst_30 = arith.constant dense<0.000000e+00> : vector<64xf32>
    %62 = vector.multi_reduction <add>, %61, %cst_30 [1] : vector<64x3xf32> to vector<64xf32>
    %63 = vector.shape_cast %62 : vector<64xf32> to vector<64x1xf32>
    %64 = arith.subf %43, %6 : vector<64x3xf32>
    %c2 = arith.constant 2 : index
    %c0_31 = arith.constant 0 : index
    %c0_32 = arith.constant 0 : index
    %65 = vector.load %arg1[%c2, %c0_31, %c0_32] : memref<3x64x32xf32, #tpu.memory_space<vmem>>, vector<1x64x32xf32>
    %66 = vector.shape_cast %65 : vector<1x64x32xf32> to vector<64x32xf32>
    %67 = arith.truncf %66 : vector<64x32xf32> to vector<64x32xbf16>
    %c2_33 = arith.constant 2 : index
    %c0_34 = arith.constant 0 : index
    %c0_35 = arith.constant 0 : index
    %68 = vector.load %arg2[%c2_33, %c0_34, %c0_35] : memref<3x64x5xf32, #tpu.memory_space<vmem>>, vector<1x64x5xf32>
    %69 = vector.shape_cast %68 : vector<1x64x5xf32> to vector<64x5xf32>
    %70 = vector.extract_strided_slice %69 {offsets = [0, 0], sizes = [64, 1], strides = [1, 1]} : vector<64x5xf32> to vector<64x1xf32>
    %71 = vector.extract_strided_slice %69 {offsets = [0, 1], sizes = [64, 1], strides = [1, 1]} : vector<64x5xf32> to vector<64x1xf32>
    %72 = vector.extract_strided_slice %69 {offsets = [0, 2], sizes = [64, 3], strides = [1, 1]} : vector<64x5xf32> to vector<64x3xf32>
    %cst_36 = arith.constant dense<0.000000e+00> : vector<64x32xf32>
    %73 = tpu.matmul %67, %0, %cst_36 {dimension_numbers = #tpu.dot_dimension_numbers<[1], [0], [0], [1], [0, 0, 1, 1], [], []>} : vector<64x32xbf16>, vector<32x32xbf16>, vector<64x32xf32> -> vector<64x32xf32>
    %74 = vector.broadcast %70 : vector<64x1xf32> to vector<64x32xf32>
    %75 = vector.broadcast %1 : vector<1x32xf32> to vector<64x32xf32>
    %76 = arith.mulf %74, %75 : vector<64x32xf32>
    %77 = arith.addf %73, %76 : vector<64x32xf32>
    %78 = vector.broadcast %71 : vector<64x1xf32> to vector<64x32xf32>
    %79 = vector.broadcast %2 : vector<1x32xf32> to vector<64x32xf32>
    %80 = arith.mulf %78, %79 : vector<64x32xf32>
    %81 = arith.addf %77, %80 : vector<64x32xf32>
    %82 = vector.broadcast %3 : vector<1x32xf32> to vector<64x32xf32>
    %83 = arith.addf %81, %82 : vector<64x32xf32>
    %cst_37 = arith.constant 0.000000e+00 : f32
    %84 = vector.broadcast %cst_37 : f32 to vector<64x32xf32>
    %85 = arith.maximumf %83, %84 : vector<64x32xf32>
    %86 = arith.truncf %85 : vector<64x32xf32> to vector<64x32xbf16>
    %cst_38 = arith.constant dense<0.000000e+00> : vector<64x32xf32>
    %87 = tpu.matmul %86, %4, %cst_38 {dimension_numbers = #tpu.dot_dimension_numbers<[1], [0], [0], [1], [0, 0, 1, 1], [], []>} : vector<64x32xbf16>, vector<32x32xbf16>, vector<64x32xf32> -> vector<64x32xf32>
    %88 = vector.broadcast %5 : vector<1x32xf32> to vector<64x32xf32>
    %89 = arith.addf %87, %88 : vector<64x32xf32>
    %90 = arith.mulf %72, %6 : vector<64x3xf32>
    %cst_39 = arith.constant dense<0.000000e+00> : vector<64xf32>
    %91 = vector.multi_reduction <add>, %90, %cst_39 [1] : vector<64x3xf32> to vector<64xf32>
    %92 = vector.shape_cast %91 : vector<64xf32> to vector<64x1xf32>
    %93 = arith.subf %72, %6 : vector<64x3xf32>
    %94 = tpu.concatenate %31, %60, %89 in 1 : vector<64x32xf32>, vector<64x32xf32>, vector<64x32xf32> -> vector<64x96xf32>
    %c0_40 = arith.constant 0 : index
    %c0_41 = arith.constant 0 : index
    %95 = vector.load %arg10[%c0_40, %c0_41] : memref<64x96xf32, #tpu.memory_space<vmem>>, vector<64x96xf32>
    tpu.vector_store %arg10[%c0_40, %c0_41], %94 {strides = array<i32>} : memref<64x96xf32, #tpu.memory_space<vmem>>, vector<64x96xf32>,
    %96 = tpu.concatenate %35, %34, %64, %63, %93, %92 in 1 : vector<64x3xf32>, vector<64x1xf32>, vector<64x3xf32>, vector<64x1xf32>, vector<64x3xf32>, vector<64x1xf32> -> vector<64x12xf32>
    %c0_42 = arith.constant 0 : index
    %c0_43 = arith.constant 0 : index
    %97 = vector.load %arg11[%c0_42, %c0_43] : memref<64x12xf32, #tpu.memory_space<vmem>>, vector<64x12xf32>
    tpu.vector_store %arg11[%c0_42, %c0_43], %96 {strides = array<i32>} : memref<64x12xf32, #tpu.memory_space<vmem>>, vector<64x12xf32>,
    return
  }
  func.func @transform_0(%arg0: i32) -> (i32, i32, i32) {
    %c0_i32 = arith.constant 0 : i32
    %c0_i32_0 = arith.constant 0 : i32
    %c0_i32_1 = arith.constant 0 : i32
    return %c0_i32, %arg0, %c0_i32_0 : i32, i32, i32
  }
  func.func @transform_1(%arg0: i32) -> (i32, i32, i32) {
    %c0_i32 = arith.constant 0 : i32
    %c0_i32_0 = arith.constant 0 : i32
    %c0_i32_1 = arith.constant 0 : i32
    return %c0_i32, %arg0, %c0_i32_0 : i32, i32, i32
  }
  func.func @transform_2(%arg0: i32) -> (i32, i32) {
    %c0_i32 = arith.constant 0 : i32
    %c0_i32_0 = arith.constant 0 : i32
    return %arg0, %c0_i32 : i32, i32
  }
  func.func @transform_3(%arg0: i32) -> (i32, i32) {
    %c0_i32 = arith.constant 0 : i32
    %c0_i32_0 = arith.constant 0 : i32
    %c0_i32_1 = arith.constant 0 : i32
    return %c0_i32, %c0_i32_0 : i32, i32
  }
  func.func @transform_4(%arg0: i32) -> (i32, i32) {
    %c0_i32 = arith.constant 0 : i32
    %c0_i32_0 = arith.constant 0 : i32
    %c0_i32_1 = arith.constant 0 : i32
    return %c0_i32, %c0_i32_0 : i32, i32
  }
  func.func @transform_5(%arg0: i32) -> (i32, i32) {
    %c0_i32 = arith.constant 0 : i32
    %c0_i32_0 = arith.constant 0 : i32
    %c0_i32_1 = arith.constant 0 : i32
    return %c0_i32, %c0_i32_0 : i32, i32
  }
  func.func @transform_6(%arg0: i32) -> (i32, i32) {
    %c0_i32 = arith.constant 0 : i32
    %c0_i32_0 = arith.constant 0 : i32
    %c0_i32_1 = arith.constant 0 : i32
    return %c0_i32, %c0_i32_0 : i32, i32
  }
  func.func @transform_7(%arg0: i32) -> (i32, i32) {
    %c0_i32 = arith.constant 0 : i32
    %c0_i32_0 = arith.constant 0 : i32
    %c0_i32_1 = arith.constant 0 : i32
    return %c0_i32, %c0_i32_0 : i32, i32
  }
  func.func @transform_8(%arg0: i32) -> (i32, i32) {
    %c0_i32 = arith.constant 0 : i32
    %c0_i32_0 = arith.constant 0 : i32
    %c0_i32_1 = arith.constant 0 : i32
    return %c0_i32, %c0_i32_0 : i32, i32
  }
  func.func @transform_9(%arg0: i32) -> (i32, i32) {
    %c0_i32 = arith.constant 0 : i32
    %c0_i32_0 = arith.constant 0 : i32
    return %arg0, %c0_i32 : i32, i32
  }
  func.func @transform_10(%arg0: i32) -> (i32, i32) {
    %c0_i32 = arith.constant 0 : i32
    %c0_i32_0 = arith.constant 0 : i32
    return %arg0, %c0_i32 : i32, i32
  }
}

</mosaic_0001>

<bundles_post_ra>
// kernel: tpu_custom_call.1
= control target key start
LH: loop header
LB: loop body
LE: loop exit
PB: predicated region body
PF: predicated region fallthrough
CT: control target
= control target key end

     0   :  { %v1723_v2 = vmov 0   ;;  %vm142_vm0 = vcmask 261120   ;;  %v1724_v27 = vmov 1   ;;  %s1725_s13 = smov 2   ;;  %s2860_s0 = inlined_call_operand.vmem [shape: f32[3,64,32], index: 0, kind: input, shape index: {}]   ;;  %s2861_s1 = inlined_call_operand.vmem [shape: f32[3,64,5], index: 1, kind: input, shape index: {}]   ;;  %s2862_s2 = inlined_call_operand.vmem [shape: f32[64,3], index: 2, kind: input, shape index: {}]   ;;  %s2863_s3 = inlined_call_operand.vmem [shape: bf16[32,32], index: 3, kind: input, shape index: {}]   ;;  %s2864_s4 = inlined_call_operand.vmem [shape: f32[1,32], index: 4, kind: input, shape index: {}]   ;;  %s2865_s5 = inlined_call_operand.vmem [shape: f32[1,32], index: 5, kind: input, shape index: {}]   ;;  %s2866_s6 = inlined_call_operand.vmem [shape: f32[1,32], index: 6, kind: input, shape index: {}]   ;;  %s2867_s7 = inlined_call_operand.vmem [shape: bf16[32,32], index: 7, kind: input, shape index: {}]   ;;  %s2868_s8 = inlined_call_operand.vmem [shape: f32[1,32], index: 8, kind: input, shape index: {}]   ;;  %s2869_s9 = inlined_call_operand.hbm [shape: f32[64,96], index: 9, kind: output, shape index: {0}]   ;;  %s2870_s10 = inlined_call_operand.vmem [shape: f32[64,12], index: 10, kind: output, shape index: {1}]  }
   0x1   :  { %v1791_v0 = vld [vmem:[%s2861_s1 + $0x10] sm:$0xff]  ;;  %v1796_v1 = vld [vmem:[%s2861_s1] sm:$0xff]  ;;  %1670 = vset.pattern.permute.xlu1 %v1723_v2  ;;  %1669 = vset.pattern.permute.xlu0 %v1723_v2  ;;  %v1811_v4 = vld [vmem:[%s2861_s1 + $0x18] sm:$0xff] }
   0x2   :  { %v1803_v3 = vld [vmem:[%s2863_s3] sm:$0xff]   ;;  %88 = vperm.xlu1 %1670, %v1791_v0   ;;  %78 = vperm.xlu0 %1669, %v1796_v1   ;;  %v1816_v5 = vld [vmem:[%s2861_s1 + $0x8] sm:$0xff]  ;;  %v58_v9 = vld [vmem:[%s2860_s0 + $0x10] sm:$0xff] }
   0x3   :  { %1587 = vmatprep.subr.bf16.mxu0 %v1803_v3  ;;  %v1821_v6 = vld [vmem:[%s2863_s3 + $0x8] sm:$0xff]   ;;  %v56_v7 = vld [vmem:[%s2860_s0] sm:$0xff]  ;;  %v59_v11 = vld [vmem:[%s2860_s0 + $0x18] sm:$0xff] }
   0x4   :  { %1588 = vmatpush3.bf16.msra.mxu0 %v1803_v3  ;;  %v57_v8 = vld [vmem:[%s2860_s0 + $0x8] sm:$0xff]  ;;  %v60_v12 = vld [vmem:[%s2860_s0 + $0x20] sm:$0xff]  ;;  %v65_v16 = vpack.c.bf16 %v59_v11, %v58_v9  ;;  %v1864_v18 = vld [vmem:[%s2861_s1 + $0x38] sm:$0xff] }
   0x5   :  { %1589 = vmatprep.subr.bf16.mxu0 %v1821_v6  ;;  %v64_v10 = vpack.c.bf16 %v57_v8, %v56_v7  ;;  %v61_v13 = vld [vmem:[%s2860_s0 + $0x28] sm:$0xff]  ;;  %v1853_v15 = vld [vmem:[%s2861_s1 + $0x20] sm:$0xff]  ;;  %v1869_v19 = vld [vmem:[%s2861_s1 + $0x30] sm:$0xff] }
   0x6   :  { %93 = vperm.xlu1 %1670, %v1811_v4   ;;  %83 = vperm.xlu0 %1669, %v1816_v5   ;;  %v1848_v14 = vld [vmem:[%s2861_s1 + $0x28] sm:$0xff]  ;;  %v66_v17 = vpack.c.bf16 %v61_v13, %v60_v12  ;;  %v62_v20 = vld [vmem:[%s2860_s0 + $0x30] sm:$0xff]  ;;  %v63_v21 = vld [vmem:[%s2860_s0 + $0x38] sm:$0xff] }
   0x7   :  { %1591 = vmatprep.mubr.msk.bf16.mxu0 %vm142_vm0, %v64_v10  ;;  %v1503_v22 = vld [vmem:[%s2860_s0 + $0x40] sm:$0xff]  ;;  %v1504_v23 = vld [vmem:[%s2860_s0 + $0x48] sm:$0xff]  ;;  %v67_v25 = vpack.c.bf16 %v63_v21, %v62_v20  ;;  %v51_v28 = vld [vmem:[%s2862_s2 + $0x18] sm:$0xff] }
   0x8   :  { %1590 = vmatpush3.bf16.msra.mxu0 %v1821_v6  ;;  %v49_v24 = vld [vmem:[%s2862_s2 + $0x8] sm:$0xff]  ;;  %v509_v26 = vpack.c.bf16 %v1504_v23, %v1503_v22  ;;  %v1505_v29 = vld [vmem:[%s2860_s0 + $0x50] sm:$0xff]  ;;  %v1506_v30 = vld [vmem:[%s2860_s0 + $0x58] sm:$0xff] }
   0x9   :  { %1611 = vmatprep.subr.bf16.mxu0 %v1803_v3  ;;  %v1507_v31 = vld [vmem:[%s2860_s0 + $0x60] sm:$0xff]  ;;  %v1508_v32 = vld [vmem:[%s2860_s0 + $0x68] sm:$0xff] }
   0xa   :  { %103 = vperm.xlu1 %1670, %v1848_v14   ;;  %98 = vperm.xlu0 %1669, %v1853_v15  }
   0xb   :  { %1592 = vmatmul.mubr.msk.bf16.vlgmr.msra.gmra.mrb[0].mxu0 %vm142_vm0, %v65_v16 }
   0xc   :  { %1595 = vmatprep.mubr.msk.bf16.mxu0 %vm142_vm0, %v66_v17  ;;  %1612 = vmatpush3.bf16.msra.mxu0 %v1803_v3 }
   0xd   :  { %1613 = vmatprep.subr.bf16.mxu0 %v1821_v6 }
   0xe   :  { %113 = vperm.xlu1 %1670, %v1864_v18   ;;  %108 = vperm.xlu0 %1669, %v1869_v19  }
  0x10   :  { %1614 = vmatpush3.bf16.msra.mxu0 %v1821_v6 }
  0x11   :  { %1635 = vmatprep.subr.bf16.mxu0 %v1803_v3 }
  0x12   :  { %1671 = vset.pattern.permute.xlu1 %v1724_v27  ;;  %405 = vrot.lane.b32.xlu0 %v49_v24, %s1725_s13 }
  0x13   :  { %225 = vperm.xlu1 %1671, %v1816_v5   ;;  %1596 = vmatmul.mubr.msk.bf16.gmra.mrb[4].mxu0 %vm142_vm0, %v67_v25 }
  0x14   :  { %1615 = vmatprep.mubr.msk.bf16.mxu0 %vm142_vm0, %v509_v26 }
  0x15   :  { %16 = vsyncpa [#allocation3], 0  ;;  %v53_v33 = vld [vmem:[%s2862_s2 + $0x28] sm:$0xff]  ;;  %v510_v34 = vpack.c.bf16 %v1506_v30, %v1505_v29  ;;  %v511_v35 = vpack.c.bf16 %v1508_v32, %v1507_v31  ;;  %v55_v36 = vld [vmem:[%s2862_s2 + $0x38] sm:$0xff]  ;;  %s1726_s18 = smov 126   ;;  %vm467_vm1 = vcmask 23552  }
  0x16   :  { %409 = vrot.lane.b32.xlu0 %v51_v28, %s1725_s13  ;;  %v1509_v37 = vld [vmem:[%s2860_s0 + $0x70] sm:$0xff]  ;;  %v1510_v38 = vld [vmem:[%s2860_s0 + $0x78] sm:$0xff]  ;;  %v1527_v39 = vld [vmem:[%s2860_s0 + $0x80] sm:$0xff]  ;;  %s1727_s26 = smov 6   ;;  %vm1422_vm2 = vcmask 31744   ;;  %vm1431_vm3 = vcmask 56320  }
  0x17   :  { %229 = vperm.xlu1 %1671, %v1791_v0   ;;  %v1528_v40 = vld [vmem:[%s2860_s0 + $0x88] sm:$0xff]  ;;  %v512_v42 = vpack.c.bf16 %v1510_v38, %v1509_v37  ;;  %v48_v44 = vld [vmem:[%s2862_s2] sm:$0xff]  ;;  %v1529_v46 = vld [vmem:[%s2860_s0 + $0x90] sm:$0xff]  ;;  %vm1440_vm4 = vcmask 64512   ;;  %vm1449_vm5 = vcmask 89088   ;;  %vm1458_vm6 = vcmask 97280  }
  0x18   :  { %v1944_v41 = vld [vmem:[%s2861_s1 + $0x48] sm:$0xff]  ;;  %v873_v43 = vpack.c.bf16 %v1528_v40, %v1527_v39  ;;  %v1530_v47 = vld [vmem:[%s2860_s0 + $0x98] sm:$0xff]  ;;  %v50_v48 = vld [vmem:[%s2862_s2 + $0x10] sm:$0xff]  ;;  %vm1300_vm7 = vcmask 523264   ;;  %vm1309_vm8 = vcmask 785408  }
  0x19   :  { %v1955_v45 = vld [vmem:[%s2861_s1 + $0x68] sm:$0xff]  ;;  %v1531_v49 = vld [vmem:[%s2860_s0 + $0xa0] sm:$0xff]  ;;  %v874_v52 = vpack.c.bf16 %v1530_v47, %v1529_v46  ;;  %v54_v55 = vld [vmem:[%s2862_s2 + $0x30] sm:$0xff] }
  0x1a   :  { %413 = vrot.lane.b32.xlu0 %v53_v33, %s1725_s13  ;;  %v1532_v50 = vld [vmem:[%s2860_s0 + $0xa8] sm:$0xff]  ;;  %v52_v53 = vld [vmem:[%s2862_s2 + $0x20] sm:$0xff]  ;;  %v1533_v56 = vld [vmem:[%s2860_s0 + $0xb0] sm:$0xff] }
  0x1b   :  { %237 = vperm.xlu1 %1671, %v1853_v15   ;;  %1616 = vmatmul.mubr.msk.bf16.vlgmr.msra.gmra.mrb[8].mxu0 %vm142_vm0, %v510_v34  ;;  %v1979_v51 = vld [vmem:[%s2861_s1 + $0x88] sm:$0xff]  ;;  %v875_v54 = vpack.c.bf16 %v1532_v50, %v1531_v49  ;;  %v1534_v57 = vld [vmem:[%s2860_s0 + $0xb8] sm:$0xff]  ;;  %v2002_v59 = vld [vmem:[%s2861_s1 + $0x40] sm:$0xff] }
  0x1c   :  { %1619 = vmatprep.mubr.msk.bf16.mxu0 %vm142_vm0, %v511_v35  ;;  %1636 = vmatpush3.bf16.msra.mxu0 %v1803_v3  ;;  %2905 = vst [vmem:[#allocation5_spill] sm:$0xff] %v1979_v51  ;;  %v876_v58 = vpack.c.bf16 %v1534_v57, %v1533_v56  ;;  %2906 = vst [vmem:[#allocation6_spill] sm:$0xff] %v2002_v59  ;;  %v2009_v60 = vld [vmem:[%s2861_s1 + $0x50] sm:$0xff]  ;;  %v2015_v61 = vld [vmem:[%s2861_s1 + $0x58] sm:$0xff] }
  0x1d   :  { %1637 = vmatprep.subr.bf16.mxu0 %v1821_v6  ;;  %2907 = vst [vmem:[#allocation7_spill] sm:$0xff] %v2009_v60  ;;  %v2024_v62 = vld [vmem:[%s2861_s1 + $0x60] sm:$0xff]  ;;  %v2031_v63 = vld [vmem:[%s2861_s1 + $0x70] sm:$0xff]  ;;  %v2037_v3 = vld [vmem:[%s2861_s1 + $0x78] sm:$0xff] }
  0x1e   :  { %417 = vrot.lane.b32.xlu0 %v55_v36, %s1725_s13  ;;  %2908 = vst [vmem:[#allocation8_spill] sm:$0xff] %v2024_v62  ;;  %2909 = vst [vmem:[#allocation9_spill] sm:$0xff] %v2031_v63  ;;  %v2053_v7 = vld [vmem:[%s2861_s1 + $0x90] sm:$0xff]  ;;  %v2059_v8 = vld [vmem:[%s2861_s1 + $0x98] sm:$0xff] }
  0x1f   :  { %245 = vperm.xlu1 %1671, %v1869_v19   ;;  %2911 = vst [vmem:[#allocation11_spill] sm:$0xff] %v2053_v7  ;;  %2912 = vst [vmem:[#allocation12_spill] sm:$0xff] %v2059_v8  ;;  %v2099_v26 = vld [vmem:[%s2861_s1 + $0xa8] sm:$0xff]  ;;  %v2119_v32 = vld [vmem:[%s2867_s7] sm:$0xff]  }
  0x20   :  { %1638 = vmatpush3.bf16.msra.mxu0 %v1821_v6  ;;  %v2046_v6 = vld [vmem:[%s2861_s1 + $0x80] sm:$0xff]  ;;  %2915 = vst [vmem:[#allocation15_spill] sm:$0xff] %v2099_v26  ;;  %1599 = vmatprep.subr.bf16.mxu1 %v2119_v32  ;;  %v2158_v35 = vld [vmem:[%s2861_s1 + $0xb8] sm:$0xff] }
  0x21   :  { %2910 = vst [vmem:[#allocation10_spill] sm:$0xff] %v2046_v6  ;;  %1600 = vmatpush3.bf16.msra.mxu1 %v2119_v32  ;;  %2921 = vst [vmem:[#allocation21_spill] sm:$0xff] %v2158_v35 }
  0x22   :  { %529 = vperm.xlu0 %1669, %v1944_v41  }
  0x23   :  { %1620 = vmatmul.mubr.msk.bf16.gmra.mrb[12].mxu0 %vm142_vm0, %v512_v42  ;;  %403 = vrot.lane.b32.xlu1 %v48_v44, %s1725_s13 }
  0x24   :  { %1639 = vmatprep.mubr.msk.bf16.mxu0 %vm142_vm0, %v873_v43  ;;  %1672 = vset.pattern.permute.xlu1 %v1723_v2 }
  0x26   :  { %549 = vperm.xlu0 %1669, %v1955_v45  }
  0x27   :  { %407 = vrot.lane.b32.xlu1 %v50_v48, %s1725_s13 }
  0x2a   :  { %893 = vperm.xlu0 %1669, %v1979_v51  }
  0x2b   :  { %1640 = vmatmul.mubr.msk.bf16.vlgmr.msra.gmra.mrb[16].mxu0 %vm142_vm0, %v874_v52  ;;  %411 = vrot.lane.b32.xlu1 %v52_v53, %s1725_s13 }
  0x2c   :  { %1643 = vmatprep.mubr.msk.bf16.mxu0 %vm142_vm0, %v875_v54 }
  0x2f   :  { %415 = vrot.lane.b32.xlu1 %v54_v55, %s1725_s13 }
  0x33   :  { %1644 = vmatmul.mubr.msk.bf16.gmra.mrb[20].mxu0 %vm142_vm0, %v876_v58  ;;  %524 = vperm.xlu1 %1672, %v2002_v59  }
  0x37   :  { %534 = vperm.xlu1 %1672, %v2009_v60  }
  0x3b   :  { %539 = vperm.xlu1 %1672, %v2015_v61  }
  0x3f   :  { %1673 = vset.pattern.permute.xlu1 %v1724_v27 }
  0x40   :  { %652 = vperm.xlu1 %1673, %v1944_v41  }
  0x44   :  { %656 = vperm.xlu1 %1673, %v2009_v60  }
  0x48   :  { %1674 = vset.pattern.permute.xlu1 %v1723_v2 }
  0x49   :  { %544 = vperm.xlu1 %1674, %v2024_v62  }
  0x4d   :  { %554 = vperm.xlu1 %1674, %v2031_v63  }
  0x51   :  { %559 = vperm.xlu1 %1674, %v2037_v3  }
  0x55   :  { %1675 = vset.pattern.permute.xlu1 %v1724_v27 }
  0x56   :  { %668 = vperm.xlu1 %1675, %v1955_v45  }
  0x5a   :  { %672 = vperm.xlu1 %1675, %v2031_v63  }
  0x5e   :  { %1676 = vset.pattern.permute.xlu1 %v1723_v2 }
  0x5f   :  { %888 = vperm.xlu1 %1676, %v2046_v6  }
  0x63   :  { %898 = vperm.xlu1 %1676, %v2053_v7  }
  0x67   :  { %903 = vperm.xlu1 %1676, %v2059_v8  }
  0x6b   :  { %1677 = vset.pattern.permute.xlu1 %v1724_v27 }
  0x6c   :  { %1016 = vperm.xlu1 %1677, %v1979_v51  }
  0x70   :  { %1020 = vperm.xlu1 %1677, %v2053_v7  }
  0x74   :  { %1678 = vset.pattern.permute.xlu1 %v1723_v2 }
  0x81   :  { %v2066_v9 = vpop.permute.xlu0 %78  ;;  %v2068_v10 = vpop.permute.xlu1 %88 }
  0x85   :  { %v2070_v11 = vpop.permute.xlu0 %83  ;;  %v2072_v12 = vpop.permute.xlu1 %93 }
  0x89   :  { %v2074_v13 = vpop.permute.xlu0 %98  ;;  %v2076_v16 = vpop.permute.xlu1 %103 }
  0x8d   :  { %v2078_v17 = vpop.permute.xlu0 %108  ;;  %v2080_v20 = vpop.permute.xlu1 %113 }
  0x91   :  { %v2082_v21 = vpop.permute.xlu0 %405 }
  0x92   :  { %2913 = vst [vmem:[#allocation13_spill] sm:$0xff] %v2082_v21  ;;  %v2084_v22 = vpop.permute.xlu1 %225  ;;  %v428_v2 = vmul.f32 %v2082_v21, %v1816_v5 }
  0x94   :  { %445 = vrot.lane.b32.xlu0 %v428_v2, %s1726_s18 }
  0x95   :  { %v2089_v23 = vpop.permute.xlu0 %409 }
  0x96   :  { %2914 = vst [vmem:[#allocation14_spill] sm:$0xff] %v2089_v23  ;;  %v2091_v24 = vpop.permute.xlu1 %229  ;;  %v430_v25 = vmul.f32 %v2089_v23, %v1811_v4 }
  0x98   :  { %449 = vrot.lane.b32.xlu0 %v430_v25, %s1726_s18 }
  0x99   :  { %v2164_v37 = vpop.permute.xlu0 %413 }
  0x9a   :  { %v2101_v28 = vpop.permute.xlu1 %237  ;;  %2923 = vst [vmem:[#allocation23_spill] sm:$0xff] %v2164_v37  ;;  %v432_v38 = vmul.f32 %v2164_v37, %v1848_v14  ;;  %v797_v54 = vmul.f32 %v1955_v45, %v2164_v37 }
  0x9c   :  { %913 = vperm.xlu0 %1669, %v2099_v26  }
  0x9e   :  { %v2104_v5 = vpop.permute.xlu1 %245 }
  0xa0   :  { %1679 = vset.pattern.permute.xlu0 %v1724_v27 }
  0xa1   :  { %221 = vperm.xlu0 %1679, %v1796_v1  }
  0xa2   :  { %v2108_v29 = vpop.permute.xlu1 %403 }
  0xa3   :  { %2916 = vst [vmem:[#allocation16_spill] sm:$0xff] %v2108_v29  ;;  %v427_v30 = vmul.f32 %v2108_v29, %v1796_v1  ;;  %v792_v48 = vmul.f32 %v2002_v59, %v2108_v29 }
  0xa5   :  { %233 = vperm.xlu0 %1679, %v1811_v4   ;;  %443 = vrot.lane.b32.xlu1 %v427_v30, %s1726_s18  ;;  %v2132_v4 = vld [vmem:[%s2867_s7 + $0x8] sm:$0xff]  }
  0xa6   :  { %v2114_v31 = vpop.permute.xlu1 %407  ;;  %1601 = vmatprep.subr.bf16.mxu1 %v2132_v4 }
  0xa7   :  { %2917 = vst [vmem:[#allocation17_spill] sm:$0xff] %v2114_v31  ;;  %v429_v33 = vmul.f32 %v2114_v31, %v1791_v0  ;;  %v2142_v0 = vld [vmem:[%s2861_s1 + $0xa0] sm:$0xff]  ;;  %1602 = vmatpush3.bf16.msra.mxu1 %v2132_v4  ;;  %v794_v43 = vmul.f32 %v2009_v60, %v2114_v31 }
  0xa8   :  { %2919 = vst [vmem:[#allocation19_spill] sm:$0xff] %v2142_v0  ;;  %1623 = vmatprep.subr.bf16.mxu1 %v2119_v32 }
  0xa9   :  { %241 = vperm.xlu0 %1679, %v1848_v14   ;;  %447 = vrot.lane.b32.xlu1 %v429_v33, %s1726_s18  ;;  %v793_v14 = vmul.f32 %v1944_v41, %v2082_v21 }
  0xaa   :  { %v2126_v1 = vpop.permute.xlu1 %411 }
  0xab   :  { %2918 = vst [vmem:[#allocation18_spill] sm:$0xff] %v2126_v1  ;;  %v431_v34 = vmul.f32 %v2126_v1, %v1853_v15  ;;  %v2151_v15 = vld [vmem:[%s2861_s1 + $0xb0] sm:$0xff]  ;;  %v796_v44 = vmul.f32 %v2024_v62, %v2126_v1 }
  0xac   :  { %2920 = vst [vmem:[#allocation20_spill] sm:$0xff] %v2151_v15 }
  0xad   :  { %249 = vperm.xlu0 %1679, %v1864_v18   ;;  %451 = vrot.lane.b32.xlu1 %v431_v34, %s1726_s18 }
  0xae   :  { %v2162_v36 = vpop.permute.xlu1 %415 }
  0xaf   :  { %2922 = vst [vmem:[#allocation22_spill] sm:$0xff] %v2162_v36  ;;  %v433_v40 = vmul.f32 %v2162_v36, %v1869_v19  ;;  %v2191_v19 = vpop.permute.xlu0 %417  ;;  %v798_v47 = vmul.f32 %v2031_v63, %v2162_v36 }
  0xb0   :  { %2924 = vst [vmem:[#allocation24_spill] sm:$0xff] %v2191_v19  ;;  %v434_v41 = vmul.f32 %v2191_v19, %v1864_v18  ;;  %v795_v18 = vmul.f32 %v2015_v61, %v2089_v23  ;;  %v799_v57 = vmul.f32 %v2037_v3, %v2191_v19  ;;  %v2301_v23 = vld [vmem:[%s2865_s5] ss:$0 sm:$0xff] }
  0xb1   :  { %648 = vperm.xlu0 %1679, %v2002_v59   ;;  %908 = vperm.xlu1 %1678, %v2142_v0  }
  0xb2   :  { %v2171_v39 = vpop.permute.xlu1 %524 }
  0xb5   :  { %660 = vperm.xlu0 %1679, %v2015_v61   ;;  %918 = vperm.xlu1 %1678, %v2151_v15  }
  0xb6   :  { %v2178_v42 = vpop.permute.xlu1 %534 }
  0xb9   :  { %664 = vperm.xlu0 %1679, %v2024_v62   ;;  %923 = vperm.xlu1 %1678, %v2158_v35  }
  0xbd   :  { %676 = vperm.xlu0 %1679, %v2037_v3   ;;  %1680 = vset.pattern.permute.xlu1 %v1724_v27  ;;  %v2185_v27 = vpop.permute.xlu1 %539 }
  0xbe   :  { %1032 = vperm.xlu1 %1680, %v2099_v26  }
  0xc1   :  { %453 = vrot.lane.b32.xlu0 %v432_v38, %s1726_s18  ;;  %v2198_v46 = vpop.permute.xlu1 %652 }
  0xc2   :  { %1036 = vperm.xlu1 %1680, %v2151_v15  }
  0xc5   :  { %1012 = vperm.xlu0 %1679, %v2046_v6   ;;  %v2207_v49 = vpop.permute.xlu1 %656 }
  0xc6   :  { %455 = vrot.lane.b32.xlu1 %v433_v40, %s1726_s18 }
  0xc9   :  { %1024 = vperm.xlu0 %1679, %v2059_v8   ;;  %v2213_v50 = vpop.permute.xlu1 %544  ;;  %v2293_v8 = vld [vmem:[%s2864_s4] ss:$0 sm:$0xff]  ;;  %s1728_s4 = smov 32  }
  0xca   :  { %810 = vrot.lane.b32.xlu1 %v793_v14, %s1726_s18 }
  0xcd   :  { %1028 = vperm.xlu0 %1679, %v2142_v0   ;;  %v2224_v58 = vpop.permute.xlu1 %554 }
  0xce   :  { %812 = vrot.lane.b32.xlu1 %v794_v43, %s1726_s18  ;;  %v2249_v43 = vpop.permute.xlu0 %529 }
  0xd1   :  { %1040 = vperm.xlu0 %1679, %v2158_v35   ;;  %v2233_v30 = vpop.permute.xlu1 %559 }
  0xd2   :  { %816 = vrot.lane.b32.xlu1 %v796_v44, %s1726_s18 }
  0xd5   :  { %457 = vrot.lane.b32.xlu0 %v434_v41, %s1726_s18  ;;  %v2239_v34 = vpop.permute.xlu1 %668 }
  0xd6   :  { %820 = vrot.lane.b32.xlu1 %v798_v47, %s1726_s18 }
  0xd9   :  { %808 = vrot.lane.b32.xlu0 %v792_v48, %s1726_s18  ;;  %v2247_v14 = vpop.permute.xlu1 %672 }
  0xdd   :  { %814 = vrot.lane.b32.xlu0 %v795_v18, %s1726_s18 }
  0xde   :  { %v1593_v52 = vpop.f32.mrb[0].mxu0  ;;  %v2259_v18 = vpop.permute.xlu1 %888 }
  0xdf   :  { %v2215_v53 = vpop.f32.mrb[1].mxu0 }
  0xe0   :  { %v2219_v55 = vpop.f32.mrb[2].mxu0 }
  0xe1   :  { %818 = vrot.lane.b32.xlu0 %v797_v54, %s1726_s18  ;;  %v192_v56 = vpop.f32.mrb[3].mxu0  ;;  %v2261_v54 = vpop.permute.xlu0 %549 }
  0xe2   :  { %v2269_v60 = vpop.permute.xlu1 %898 }
  0xe5   :  { %822 = vrot.lane.b32.xlu0 %v799_v57, %s1726_s18  ;;  %v2273_v15 = vpop.permute.xlu0 %893 }
  0xe6   :  { %v2227_v61 = vpop.f32.mrb[4].mxu0  ;;  %v2277_v1 = vpop.permute.xlu1 %903 }
  0xe7   :  { %v2229_v2 = vpop.f32.mrb[5].mxu0 }
  0xe8   :  { %v2231_v25 = vpop.f32.mrb[6].mxu0 }
  0xe9   :  { %v2235_v45 = vpop.f32.mrb[7].mxu0 }
  0xeb   :  { %v2286_v51 = vpop.permute.xlu1 %1016 }
  0xee   :  { %v2237_v33 = vpop.f32.mrb[8].mxu0 }
  0xef   :  { %v2241_v38 = vpop.f32.mrb[9].mxu0  ;;  %v2288_v21 = vpop.permute.xlu1 %1020 }
  0xf0   :  { %v2243_v3 = vpop.f32.mrb[10].mxu0 }
  0xf1   :  { %v2245_v40 = vpop.f32.mrb[11].mxu0 }
  0xf6   :  { %v2251_v44 = vpop.f32.mrb[12].mxu0 }
  0xf7   :  { %v2253_v41 = vpop.f32.mrb[13].mxu0 }
  0xf8   :  { %v2255_v47 = vpop.f32.mrb[14].mxu0 }
  0xf9   :  { %v2257_v48 = vpop.f32.mrb[15].mxu0 }
  0xfe   :  { %v2263_v57 = vpop.f32.mrb[16].mxu0 }
  0xff   :  { %v2265_v63 = vpop.f32.mrb[17].mxu0 }
 0x100   :  { %v2267_v62 = vpop.f32.mrb[18].mxu0 }
 0x101   :  { %2925 = vst [vmem:[#allocation25_spill] sm:$0xff] %v2267_v62  ;;  %v2271_v59 = vpop.f32.mrb[19].mxu0  ;;  %v260_v62 = vmul.f32 %v2301_v23, %v2091_v24  ;;  %v125_v24 = vmul.f32 %v2293_v8, %v2072_v12  ;;  %v127_v12 = vmul.f32 %v2293_v8, %v2076_v16 }
 0x103   :  { %v209_v16 = vadd.f32 %v2235_v45, %v127_v12  ;;  %v562_v45 = vmul.f32 %v2293_v8, %v2171_v39  ;;  %v567_v39 = vmul.f32 %v2293_v8, %v2261_v54  ;;  %v568_v54 = vmul.f32 %v2293_v8, %v2224_v58 }
 0x106   :  { %v446_v36 = vpop.permute.xlu0 %445  ;;  %v2275_v0 = vpop.f32.mrb[20].mxu0 }
 0x107   :  { %2926 = vst [vmem:[#allocation26_spill] sm:$0xff] %v2275_v0  ;;  %v471_v7 = vsel %vm467_vm1, %v446_v36, 0.0  ;;  %v2280_v31 = vpop.f32.mrb[21].mxu0 }
 0x108   :  { %2927 = vst [vmem:[#allocation27_spill] sm:$0xff] %v2280_v31  ;;  %472 = vadd.xlane.f32.xlu0 %v471_v7  ;;  %v2282_v35 = vpop.f32.mrb[22].mxu0  ;;  %v123_v7 = vmul.f32 %v2293_v8, %v2070_v11  ;;  %v124_v31 = vmul.f32 %v2293_v8, %v2068_v10  ;;  %v259_v11 = vmul.f32 %v2301_v23, %v2084_v22 }
 0x109   :  { %2928 = vst [vmem:[#allocation28_spill] sm:$0xff] %v2282_v35  ;;  %v2284_v19 = vpop.f32.mrb[23].mxu0 }
 0x10a   :  { %2929 = vst [vmem:[#allocation29_spill] sm:$0xff] %v2284_v19  ;;  %v450_v26 = vpop.permute.xlu0 %449  ;;  %v193_v6 = vadd.f32 %v192_v56, %v123_v7  ;;  %v122_v19 = vmul.f32 %v2293_v8, %v2066_v9  ;;  %v2323_v9 = vld [vmem:[%s2866_s6] ss:$0 sm:$0xff] }
 0x10b   :  { %v477_v0 = vsel %vm467_vm1, %v450_v26, 0.0  ;;  %v126_v26 = vmul.f32 %v2293_v8, %v2074_v13  ;;  %v128_v13 = vmul.f32 %v2293_v8, %v2078_v17 }
 0x10c   :  { %v267_v56 = vadd.f32 %v259_v11, %v193_v6 }
 0x10d   :  { %v214_v11 = vadd.f32 %v2227_v61, %v128_v13 }
 0x117   :  { %v444_v37 = vpop.permute.xlu1 %443 }
 0x118   :  { %v468_v36 = vsel %vm467_vm1, %v444_v37, 0.0 }
 0x119   :  { %469 = vadd.xlane.f32.xlu1 %v468_v36  ;;  %v198_v36 = vadd.f32 %v1593_v52, %v124_v31  ;;  %v206_v31 = vadd.f32 %v2229_v2, %v126_v26  ;;  %v281_v52 = vadd.f32 %v2323_v9, %v267_v56 }
 0x11b   :  { %v2303_v29 = vpop.permute.xlu0 %913  ;;  %v448_v35 = vpop.permute.xlu1 %447  ;;  %v268_v6 = vadd.f32 %v260_v62, %v198_v36 }
 0x11c   :  { %2930 = vst [vmem:[#allocation30_spill] sm:$0xff] %v2303_v29  ;;  %v474_v37 = vsel %vm467_vm1, %v448_v35, 0.0  ;;  %v190_v35 = vadd.f32 %v2215_v53, %v122_v19  ;;  %v201_v53 = vadd.f32 %v2219_v55, %v125_v24  ;;  %v264_v55 = vmul.f32 %v2301_v23, %v2104_v5 }
 0x11d   :  { %478 = vadd.xlane.f32.xlu1 %v477_v0  ;;  %475 = vadd.xlane.f32.xlu0 %v474_v37  ;;  %v282_v2 = vadd.f32 %v2323_v9, %v268_v6  ;;  %v564_v6 = vmul.f32 %v2293_v8, %v2178_v42 }
 0x11f   :  { %v452_v7 = vpop.permute.xlu1 %451  ;;  %v290_v24 = vmax.f32 %v282_v2, 0.0 }
 0x120   :  { %v222_v29 = vpop.permute.xlu0 %221  ;;  %v480_v10 = vsel %vm467_vm1, %v452_v7, 0.0  ;;  %v289_v7 = vmax.f32 %v281_v52, 0.0 }
 0x121   :  { %v258_v22 = vmul.f32 %v2301_v23, %v222_v29  ;;  %481 = vadd.xlane.f32.xlu0 %v480_v10  ;;  %v262_v29 = vmul.f32 %v2301_v23, %v2101_v28  ;;  %v129_v28 = vmul.f32 %v2293_v8, %v2080_v20  ;;  %v563_v10 = vmul.f32 %v2293_v8, %v2249_v43 }
 0x122   :  { %v680_v20 = vmul.f32 %v2301_v23, %v2198_v46 }
 0x123   :  { %v266_v0 = vadd.f32 %v258_v22, %v190_v35  ;;  %v270_v36 = vadd.f32 %v262_v29, %v206_v31  ;;  %v272_v31 = vadd.f32 %v264_v55, %v214_v11  ;;  %v620_v43 = vadd.f32 %v2245_v40, %v563_v10 }
 0x124   :  { %v234_v19 = vpop.permute.xlu0 %233 }
 0x125   :  { %v261_v37 = vmul.f32 %v2301_v23, %v234_v19  ;;  %v280_v62 = vadd.f32 %v2323_v9, %v266_v0  ;;  %v284_v5 = vadd.f32 %v2323_v9, %v270_v36  ;;  %v217_v19 = vadd.f32 %v2231_v25, %v129_v28 }
 0x126   :  { %v286_v40 = vadd.f32 %v2323_v9, %v272_v31  ;;  %v688_v12 = vadd.f32 %v680_v20, %v620_v43  ;;  %v565_v25 = vmul.f32 %v2293_v8, %v2185_v27  ;;  %v684_v27 = vmul.f32 %v2301_v23, %v2239_v34 }
 0x127   :  { %v269_v56 = vadd.f32 %v261_v37, %v201_v53  ;;  %v288_v17 = vmax.f32 %v280_v62, 0.0  ;;  %v681_v53 = vmul.f32 %v2301_v23, %v2207_v49  ;;  %v625_v37 = vadd.f32 %v2237_v33, %v564_v6 }
 0x128   :  { %v242_v26 = vpop.permute.xlu0 %241  ;;  %v292_v62 = vmax.f32 %v284_v5, 0.0  ;;  %v617_v49 = vadd.f32 %v2241_v38, %v562_v45  ;;  %v294_v28 = vmax.f32 %v286_v40, 0.0  ;;  %v696_v10 = vadd.f32 %v2323_v9, %v688_v12 }
 0x129   :  { %v283_v35 = vadd.f32 %v2323_v9, %v269_v56  ;;  %v263_v61 = vmul.f32 %v2301_v23, %v242_v26  ;;  %v296_v22 = vpack.c.bf16 %v289_v7, %v288_v17  ;;  %v689_v55 = vadd.f32 %v681_v53, %v625_v37 }
 0x12a   :  { %v636_v26 = vadd.f32 %v2257_v48, %v567_v39  ;;  %v628_v58 = vadd.f32 %v2243_v3, %v565_v25  ;;  %v704_v31 = vmax.f32 %v696_v10, 0.0  ;;  %v569_v3 = vmul.f32 %v2293_v8, %v2233_v30 }
 0x12b   :  { %v291_v0 = vmax.f32 %v283_v35, 0.0  ;;  %v271_v52 = vadd.f32 %v263_v61, %v209_v16  ;;  %1603 = vmatprep.mubr.msk.bf16.mxu1 %vm142_vm0, %v296_v22  ;;  %v566_v35 = vmul.f32 %v2293_v8, %v2213_v50  ;;  %v697_v48 = vadd.f32 %v2323_v9, %v689_v55 }
 0x12c   :  { %v250_v13 = vpop.permute.xlu0 %249  ;;  %v641_v50 = vadd.f32 %v2251_v44, %v568_v54  ;;  %v692_v5 = vadd.f32 %v684_v27, %v636_v26  ;;  %v927_v30 = vmul.f32 %v2293_v8, %v2273_v15  ;;  %v928_v39 = vmul.f32 %v2293_v8, %v2269_v60 }
 0x12d   :  { %v285_v42 = vadd.f32 %v2323_v9, %v271_v52  ;;  %v265_v46 = vmul.f32 %v2301_v23, %v250_v13  ;;  %v297_v29 = vpack.c.bf16 %v291_v0, %v290_v24  ;;  %v685_v24 = vmul.f32 %v2301_v23, %v2247_v14 }
 0x12e   :  { %v633_v13 = vadd.f32 %v2253_v41, %v566_v35  ;;  %v705_v44 = vmax.f32 %v697_v48, 0.0  ;;  %v1044_v25 = vmul.f32 %v2301_v23, %v2286_v51  ;;  %v1045_v55 = vmul.f32 %v2301_v23, %v2288_v21 }
 0x12f   :  { %v293_v2 = vmax.f32 %v285_v42, 0.0  ;;  %v273_v11 = vadd.f32 %v265_v46, %v217_v19  ;;  %1604 = vmatmul.mubr.msk.bf16.vlgmr.msra.gmra.mrb[0].mxu1 %vm142_vm0, %v297_v29  ;;  %v693_v46 = vadd.f32 %v685_v24, %v641_v50  ;;  %v700_v29 = vadd.f32 %v2323_v9, %v692_v5  ;;  %v2932_v24 = vld [vmem:[#allocation25_spill] sm:$0xff] }
 0x130   :  { %v649_v36 = vpop.permute.xlu0 %648  ;;  %v2370_v56 = vpop.permute.xlu1 %908  ;;  %1624 = vmatpush3.bf16.msra.mxu1 %v2119_v32 }
 0x131   :  { %v287_v33 = vadd.f32 %v2323_v9, %v273_v11  ;;  %v679_v17 = vmul.f32 %v2301_v23, %v649_v36  ;;  %v298_v7 = vpack.c.bf16 %v293_v2, %v292_v62  ;;  %1625 = vmatprep.subr.bf16.mxu1 %v2132_v4  ;;  %v644_v62 = vadd.f32 %v2255_v47, %v569_v3 }
 0x132   :  { %v984_v36 = vadd.f32 %v2271_v59, %v927_v30  ;;  %v708_v15 = vmax.f32 %v700_v29, 0.0  ;;  %v989_v59 = vadd.f32 %v2263_v57, %v928_v39  ;;  %v2935_v29 = vld [vmem:[#allocation27_spill] sm:$0xff] }
 0x133   :  { %v295_v38 = vmax.f32 %v287_v33, 0.0  ;;  %v687_v16 = vadd.f32 %v679_v17, %v617_v49  ;;  %1607 = vmatprep.mubr.msk.bf16.mxu1 %vm142_vm0, %v298_v7  ;;  %v701_v49 = vadd.f32 %v2323_v9, %v693_v46  ;;  %v926_v7 = vmul.f32 %v2293_v8, %v2259_v18 }
 0x134   :  { %v661_v61 = vpop.permute.xlu0 %660  ;;  %v2386_v22 = vpop.permute.xlu1 %918  ;;  %1626 = vmatpush3.bf16.msra.mxu1 %v2132_v4  ;;  %v1052_v27 = vadd.f32 %v1044_v25, %v984_v36  ;;  %v929_v18 = vmul.f32 %v2293_v8, %v2277_v1 }
 0x135   :  { %v695_v34 = vadd.f32 %v2323_v9, %v687_v16  ;;  %v682_v6 = vmul.f32 %v2301_v23, %v661_v61  ;;  %v299_v20 = vpack.c.bf16 %v295_v38, %v294_v28  ;;  %1647 = vmatprep.subr.bf16.mxu1 %v2119_v32  ;;  %v709_v10 = vmax.f32 %v701_v49, 0.0  ;;  %v2931_v16 = vld [vmem:[#allocation30_spill] sm:$0xff] }
 0x136   :  { %v981_v38 = vadd.f32 %v2265_v63, %v926_v7  ;;  %v931_v57 = vmul.f32 %v2293_v8, %v2931_v16  ;;  %v930_v63 = vmul.f32 %v2293_v8, %v2370_v56  ;;  %v992_v50 = vadd.f32 %v2932_v24, %v929_v18 }
 0x137   :  { %v703_v43 = vmax.f32 %v695_v34, 0.0  ;;  %v690_v0 = vadd.f32 %v682_v6, %v628_v58  ;;  %1608 = vmatmul.mubr.msk.bf16.gmra.mrb[4].mxu1 %vm142_vm0, %v299_v20  ;;  %v1060_v58 = vadd.f32 %v2323_v9, %v1052_v27  ;;  %v1053_v34 = vadd.f32 %v1045_v55, %v989_v59 }
 0x138   :  { %v665_v52 = vpop.permute.xlu0 %664  ;;  %v2400_v45 = vpop.permute.xlu1 %923  ;;  %v932_v6 = vmul.f32 %v2293_v8, %v2386_v22 }
 0x139   :  { %v698_v19 = vadd.f32 %v2323_v9, %v690_v0  ;;  %v683_v14 = vmul.f32 %v2301_v23, %v665_v52  ;;  %v711_v42 = vpack.c.bf16 %v704_v31, %v703_v43  ;;  %v2933_v31 = vld [vmem:[#allocation29_spill] sm:$0xff]  ;;  %v1068_v3 = vmax.f32 %v1060_v58, 0.0 }
 0x13a   :  { %v1000_v5 = vadd.f32 %v2933_v31, %v931_v57  ;;  %v1061_v52 = vadd.f32 %v2323_v9, %v1053_v34  ;;  %v933_v30 = vmul.f32 %v2293_v8, %v2400_v45  ;;  %v2942_v31 = vld [vmem:[#allocation15_spill] sm:$0xff] }
 0x13b   :  { %v706_v53 = vmax.f32 %v698_v19, 0.0  ;;  %v691_v40 = vadd.f32 %v683_v14, %v633_v13  ;;  %1627 = vmatprep.mubr.msk.bf16.mxu1 %vm142_vm0, %v711_v42  ;;  %v2934_v13 = vld [vmem:[#allocation26_spill] sm:$0xff] }
 0x13c   :  { %v677_v37 = vpop.permute.xlu0 %676  ;;  %v1005_v19 = vadd.f32 %v2934_v13, %v932_v6 }
 0x13d   :  { %v712_v41 = vpack.c.bf16 %v706_v53, %v705_v44  ;;  %v699_v12 = vadd.f32 %v2323_v9, %v691_v40  ;;  %v686_v2 = vmul.f32 %v2301_v23, %v677_v37  ;;  %v1033_v11 = vpop.permute.xlu1 %1032  ;;  %v997_v53 = vadd.f32 %v2935_v29, %v930_v63  ;;  %v2939_v63 = vld [vmem:[#allocation14_spill] sm:$0xff] }
 0x13e   :  { %v1048_v20 = vmul.f32 %v2301_v23, %v1033_v11  ;;  %v2951_v29 = vld [vmem:[#allocation22_spill] sm:$0xff] }
 0x13f   :  { %v707_v33 = vmax.f32 %v699_v12, 0.0  ;;  %v694_v17 = vadd.f32 %v686_v2, %v644_v62  ;;  %1628 = vmatmul.mubr.msk.bf16.vlgmr.msra.gmra.mrb[8].mxu1 %vm142_vm0, %v712_v41  ;;  %v1069_v2 = vmax.f32 %v1061_v52, 0.0  ;;  %v2946_v52 = vld [vmem:[#allocation21_spill] sm:$0xff] }
 0x140   :  { %v454_v47 = vpop.permute.xlu0 %453  ;;  %1648 = vmatpush3.bf16.msra.mxu1 %v2119_v32  ;;  %v1056_v42 = vadd.f32 %v1048_v20, %v1000_v5  ;;  %v2938_v20 = vld [vmem:[#allocation10_spill] sm:$0xff] }
 0x141   :  { %v713_v54 = vpack.c.bf16 %v708_v15, %v707_v33  ;;  %v702_v60 = vadd.f32 %v2323_v9, %v694_v17  ;;  %v1037_v28 = vpop.permute.xlu1 %1036  ;;  %v483_v51 = vsel %vm467_vm1, %v454_v47, 0.0  ;;  %1649 = vmatprep.subr.bf16.mxu1 %v2132_v4  ;;  %v2936_v33 = vld [vmem:[#allocation28_spill] sm:$0xff] }
 0x142   :  { %484 = vadd.xlane.f32.xlu1 %v483_v51  ;;  %v1049_v56 = vmul.f32 %v2301_v23, %v1037_v28  ;;  %v1064_v39 = vadd.f32 %v2323_v9, %v1056_v42  ;;  %v1008_v8 = vadd.f32 %v2936_v33, %v933_v30 }
 0x143   :  { %v710_v32 = vmax.f32 %v702_v60, 0.0  ;;  %1631 = vmatprep.mubr.msk.bf16.mxu1 %vm142_vm0, %v713_v54 }
 0x144   :  { %v1013_v26 = vpop.permute.xlu0 %1012  ;;  %1650 = vmatpush3.bf16.msra.mxu1 %v2132_v4  ;;  %v1057_v25 = vadd.f32 %v1049_v56, %v1005_v19  ;;  %v1072_v60 = vmax.f32 %v1064_v39, 0.0  ;;  %v2947_v19 = vld [vmem:[#allocation17_spill] sm:$0xff]  ;;  %v2949_v56 = vld [vmem:[#allocation18_spill] sm:$0xff] }
 0x145   :  { %v714_v35 = vpack.c.bf16 %v710_v32, %v709_v10  ;;  %v1043_v61 = vmul.f32 %v2301_v23, %v1013_v26  ;;  %v456_v21 = vpop.permute.xlu1 %455 }
 0x146   :  { %v486_v1 = vsel %vm467_vm1, %v456_v21, 0.0  ;;  %v1065_v28 = vadd.f32 %v2323_v9, %v1057_v25 }
 0x147   :  { %v1051_v4 = vadd.f32 %v1043_v61, %v981_v38  ;;  %487 = vadd.xlane.f32.xlu0 %v486_v1  ;;  %1632 = vmatmul.mubr.msk.bf16.gmra.mrb[12].mxu1 %vm142_vm0, %v714_v35  ;;  %v2937_v1 = vld [vmem:[#allocation16_spill] sm:$0xff] }
 0x148   :  { %v1025_v48 = vpop.permute.xlu0 %1024  ;;  %v1073_v26 = vmax.f32 %v1065_v28, 0.0 }
 0x149   :  { %v1059_v43 = vadd.f32 %v2323_v9, %v1051_v4  ;;  %v1046_v22 = vmul.f32 %v2301_v23, %v1025_v48  ;;  %v811_v0 = vpop.permute.xlu1 %810  ;;  %v1156_v4 = vmul.f32 %v2938_v20, %v2937_v1  ;;  %v2940_v48 = vld [vmem:[#allocation12_spill] sm:$0xff] }
 0x14a   :  { %v835_v14 = vsel %vm467_vm1, %v811_v0, 0.0  ;;  %v1159_v24 = vmul.f32 %v2940_v48, %v2939_v63 }
 0x14b   :  { %v1067_v44 = vmax.f32 %v1059_v43, 0.0  ;;  %v1054_v46 = vadd.f32 %v1046_v22, %v992_v50  ;;  %836 = vadd.xlane.f32.xlu0 %v835_v14  ;;  %v2941_v50 = vld [vmem:[#allocation23_spill] sm:$0xff]  ;;  %v2943_v43 = vld [vmem:[#allocation13_spill] sm:$0xff] }
 0x14c   :  { %v1029_v40 = vpop.permute.xlu0 %1028  ;;  %v1161_v5 = vmul.f32 %v2942_v31, %v2941_v50  ;;  %v2944_v22 = vld [vmem:[#allocation5_spill] sm:$0xff]  ;;  %v2948_v14 = vld [vmem:[#allocation11_spill] sm:$0xff] }
 0x14d   :  { %v1075_v37 = vpack.c.bf16 %v1068_v3, %v1067_v44  ;;  %v1062_v62 = vadd.f32 %v2323_v9, %v1054_v46  ;;  %v1047_v41 = vmul.f32 %v2301_v23, %v1029_v40  ;;  %v813_v12 = vpop.permute.xlu1 %812  ;;  %v1157_v0 = vmul.f32 %v2944_v22, %v2943_v43  ;;  %v2945_v3 = vld [vmem:[#allocation24_spill] sm:$0xff]  ;;  %v2950_v44 = vld [vmem:[#allocation19_spill] sm:$0xff] }
 0x14e   :  { %v838_v11 = vsel %vm467_vm1, %v813_v12, 0.0  ;;  %v1163_v13 = vmul.f32 %v2946_v52, %v2945_v3  ;;  %v1158_v42 = vmul.f32 %v2948_v14, %v2947_v19  ;;  %v1160_v46 = vmul.f32 %v2950_v44, %v2949_v56 }
 0x14f   :  { %v1070_v36 = vmax.f32 %v1062_v62, 0.0  ;;  %v1055_v49 = vadd.f32 %v1047_v41, %v997_v53  ;;  %839 = vadd.xlane.f32.xlu0 %v838_v11  ;;  %1651 = vmatprep.mubr.msk.bf16.mxu1 %vm142_vm0, %v1075_v37  ;;  %v2952_v53 = vld [vmem:[#allocation20_spill] sm:$0xff] }
 0x150   :  { %v1041_v15 = vpop.permute.xlu0 %1040  ;;  %v1162_v40 = vmul.f32 %v2952_v53, %v2951_v29 }
 0x151   :  { %v1076_v45 = vpack.c.bf16 %v1070_v36, %v1069_v2  ;;  %v1063_v17 = vadd.f32 %v2323_v9, %v1055_v49  ;;  %v1050_v47 = vmul.f32 %v2301_v23, %v1041_v15  ;;  %v817_v7 = vpop.permute.xlu1 %816 }
 0x152   :  { %v844_v54 = vsel %vm467_vm1, %v817_v7, 0.0 }
 0x153   :  { %v1071_v51 = vmax.f32 %v1063_v17, 0.0  ;;  %v1058_v59 = vadd.f32 %v1050_v47, %v1008_v8  ;;  %845 = vadd.xlane.f32.xlu0 %v844_v54  ;;  %1652 = vmatmul.mubr.msk.bf16.vlgmr.msra.gmra.mrb[16].mxu1 %vm142_vm0, %v1076_v45 }
 0x154   :  { %v458_v27 = vpop.permute.xlu0 %457 }
 0x155   :  { %v1077_v55 = vpack.c.bf16 %v1072_v60, %v1071_v51  ;;  %v1066_v10 = vadd.f32 %v2323_v9, %v1058_v59  ;;  %v821_v32 = vpop.permute.xlu1 %820  ;;  %v489_v18 = vsel %vm467_vm1, %v458_v27, 0.0 }
 0x156   :  { %490 = vadd.xlane.f32.xlu1 %v489_v18  ;;  %v850_v23 = vsel %vm467_vm1, %v821_v32, 0.0 }
 0x157   :  { %v1074_v38 = vmax.f32 %v1066_v10, 0.0  ;;  %851 = vadd.xlane.f32.xlu0 %v850_v23  ;;  %1655 = vmatprep.mubr.msk.bf16.mxu1 %vm142_vm0, %v1077_v55 }
 0x158   :  { %v809_v16 = vpop.permute.xlu0 %808 }
 0x159   :  { %v1078_v57 = vpack.c.bf16 %v1074_v38, %v1073_v26  ;;  %v832_v35 = vsel %vm467_vm1, %v809_v16, 0.0  ;;  %v2541_v38 = vld [vmem:[%s2868_s8] ss:$0 sm:$0xff] }
 0x15a   :  { %833 = vadd.xlane.f32.xlu1 %v832_v35 }
 0x15b   :  { %1656 = vmatmul.mubr.msk.bf16.gmra.mrb[20].mxu1 %vm142_vm0, %v1078_v57 }
 0x15c   :  { %v815_v61 = vpop.permute.xlu0 %814 }
 0x15d   :  { %v841_v9 = vsel %vm467_vm1, %v815_v61, 0.0 }
 0x15e   :  { %842 = vadd.xlane.f32.xlu1 %v841_v9 }
 0x160   :  { %v819_v21 = vpop.permute.xlu0 %818 }
 0x161   :  { %v847_v58 = vsel %vm467_vm1, %v819_v21, 0.0 }
 0x162   :  { %848 = vadd.xlane.f32.xlu1 %v847_v58 }
 0x164   :  { %v823_v34 = vpop.permute.xlu0 %822 }
 0x165   :  { %v853_v6 = vsel %vm467_vm1, %v823_v34, 0.0 }
 0x166   :  { %854 = vadd.xlane.f32.xlu1 %v853_v6 }
 0x16d   :  { %1172 = vrot.lane.b32.xlu0 %v1156_v4, %s1726_s18  ;;  %v1685_v4 = vld [vmem:[%s2861_s1] sm:$0xff] }
 0x16e   :  { %v492_v48 = vsub.f32 %v1685_v4, %v2937_v1 }
 0x171   :  { %1178 = vrot.lane.b32.xlu0 %v1159_v24, %s1726_s18 }
 0x175   :  { %1182 = vrot.lane.b32.xlu0 %v1161_v5, %s1726_s18  ;;  %v1686_v5 = vld [vmem:[%s2861_s1 + $0x10] sm:$0xff] }
 0x176   :  { %v494_v22 = vsub.f32 %v1686_v5, %v2947_v19 }
 0x177   :  { %1174 = vrot.lane.b32.xlu1 %v1157_v0, %s1726_s18 }
 0x179   :  { %1186 = vrot.lane.b32.xlu0 %v1163_v13, %s1726_s18 }
 0x17b   :  { %1176 = vrot.lane.b32.xlu1 %v1158_v42, %s1726_s18 }
 0x17f   :  { %1180 = vrot.lane.b32.xlu1 %v1160_v46, %s1726_s18 }
 0x183   :  { %1184 = vrot.lane.b32.xlu1 %v1162_v40, %s1726_s18 }
 0x195   :  { %v2499_v30 = vpop.xlane.xlu0 %472 }
 0x1a6   :  { %v2507_v12 = vpop.xlane.xlu1 %469 }
 0x1aa   :  { %v2501_v37 = vpop.xlane.xlu0 %475  ;;  %v2511_v11 = vpop.xlane.xlu1 %478 }
 0x1ae   :  { %v2503_v62 = vpop.xlane.xlu0 %481 }
 0x1cf   :  { %v2515_v25 = vpop.xlane.xlu1 %484 }
 0x1d4   :  { %v2505_v41 = vpop.xlane.xlu0 %487 }
 0x1d8   :  { %v2509_v2 = vpop.xlane.xlu0 %836 }
 0x1dc   :  { %v2513_v39 = vpop.xlane.xlu0 %839 }
 0x1e0   :  { %v2517_v36 = vpop.xlane.xlu0 %845 }
 0x1e3   :  { %v2519_v49 = vpop.xlane.xlu1 %490 }
 0x1e4   :  { %v2521_v15 = vpop.xlane.xlu0 %851 }
 0x1e7   :  { %v2523_v33 = vpop.xlane.xlu1 %833 }
 0x1e8   :  { %v1173_v8 = vpop.permute.xlu0 %1172 }
 0x1e9   :  { %v1196_v45 = vsel %vm467_vm1, %v1173_v8, 0.0 }
 0x1ea   :  { %1197 = vadd.xlane.f32.xlu1 %v1196_v45 }
 0x1eb   :  { %v2526_v17 = vpop.xlane.xlu1 %842 }
 0x1ec   :  { %v1179_v47 = vpop.permute.xlu0 %1178 }
 0x1ed   :  { %v1205_v7 = vsel %vm467_vm1, %v1179_v47, 0.0  ;;  %v1687_v47 = vld [vmem:[%s2861_s1 + $0x20] sm:$0xff] }
 0x1ee   :  { %1206 = vadd.xlane.f32.xlu1 %v1205_v7  ;;  %v496_v7 = vsub.f32 %v1687_v47, %v2949_v56 }
 0x1ef   :  { %v2529_v54 = vpop.xlane.xlu1 %848 }
 0x1f0   :  { %v1183_v60 = vpop.permute.xlu0 %1182 }
 0x1f1   :  { %v1211_v28 = vsel %vm467_vm1, %v1183_v60, 0.0 }
 0x1f2   :  { %1212 = vadd.xlane.f32.xlu1 %v1211_v28  ;;  %v1688_v28 = vld [vmem:[%s2861_s1 + $0x30] sm:$0xff] }
 0x1f3   :  { %v2532_v51 = vpop.xlane.xlu1 %854 }
 0x1f4   :  { %v1187_v59 = vpop.permute.xlu0 %1186 }
 0x1f5   :  { %v1217_v27 = vsel %vm467_vm1, %v1187_v59, 0.0  ;;  %v498_v59 = vsub.f32 %v1688_v28, %v2951_v29  ;;  %v1692_v28 = vld [vmem:[%s2861_s1 + $0x38] sm:$0xff] }
 0x1f6   :  { %1218 = vadd.xlane.f32.xlu1 %v1217_v27 }
 0x1f7   :  { %v1175_v55 = vpop.permute.xlu1 %1174 }
 0x1f8   :  { %v1199_v10 = vsel %vm467_vm1, %v1175_v55, 0.0 }
 0x1f9   :  { %1200 = vadd.xlane.f32.xlu0 %v1199_v10 }
 0x1fb   :  { %v1177_v32 = vpop.permute.xlu1 %1176 }
 0x1fc   :  { %v1202_v18 = vsel %vm467_vm1, %v1177_v32, 0.0 }
 0x1fd   :  { %1203 = vadd.xlane.f32.xlu0 %v1202_v18  ;;  %v2953_v18 = vld [vmem:[#allocation6_spill] sm:$0xff] }
 0x1ff   :  { %v1181_v23 = vpop.permute.xlu1 %1180 }
 0x200   :  { %v1208_v26 = vsel %vm467_vm1, %v1181_v23, 0.0  ;;  %v856_v23 = vsub.f32 %v2953_v18, %v2937_v1 }
 0x201   :  { %1209 = vadd.xlane.f32.xlu0 %v1208_v26  ;;  %v2954_v26 = vld [vmem:[#allocation7_spill] sm:$0xff] }
 0x202   :  { %v1605_v16 = vpop.f32.mrb[0].mxu1 }
 0x203   :  { %v2544_v57 = vadd.f32 %v1605_v16, %v2541_v38  ;;  %v1185_v35 = vpop.permute.xlu1 %1184  ;;  %v364_v61 = vpop.f32.mrb[1].mxu1  ;;  %v858_v16 = vsub.f32 %v2954_v26, %v2947_v19 }
 0x204   :  { %v2547_v9 = vadd.f32 %v2541_v38, %v364_v61  ;;  %v1606_v21 = vpop.f32.mrb[2].mxu1  ;;  %v1214_v58 = vsel %vm467_vm1, %v1185_v35, 0.0  ;;  %v1689_v35 = vld [vmem:[%s2861_s1 + $0x8] sm:$0xff] }
 0x205   :  { %v2551_v34 = vadd.f32 %v1606_v21, %v2541_v38  ;;  %1215 = vadd.xlane.f32.xlu0 %v1214_v58  ;;  %v367_v6 = vpop.f32.mrb[3].mxu1  ;;  %v493_v61 = vsub.f32 %v1689_v35, %v2943_v43  ;;  %v1222_v35 = vsub.f32 %v2948_v14, %v2947_v19 }
 0x206   :  { %v2558_v24 = vadd.f32 %v2541_v38, %v367_v6 }
 0x207   :  { %1326 = vrot.lane.b32.xlu1 %v492_v48, %s1726_s18  ;;  %v2955_v48 = vld [vmem:[#allocation8_spill] sm:$0xff] }
 0x208   :  { %v860_v5 = vsub.f32 %v2955_v48, %v2949_v56  ;;  %v1694_v48 = vld [vmem:[%s2861_s1 + $0x58] sm:$0xff] }
 0x20a   :  { %v1609_v0 = vpop.f32.mrb[4].mxu1 }
 0x20b   :  { %v2566_v13 = vadd.f32 %v1609_v0, %v2541_v38  ;;  %1330 = vrot.lane.b32.xlu1 %v494_v22, %s1726_s18  ;;  %v380_v42 = vpop.f32.mrb[5].mxu1  ;;  %v1690_v22 = vld [vmem:[%s2861_s1 + $0x18] sm:$0xff] }
 0x20c   :  { %v2570_v46 = vadd.f32 %v2541_v38, %v380_v42  ;;  %v1610_v40 = vpop.f32.mrb[6].mxu1  ;;  %v495_v0 = vsub.f32 %v1690_v22, %v2939_v63  ;;  %v2956_v42 = vld [vmem:[#allocation9_spill] sm:$0xff] }
 0x20d   :  { %v2573_v8 = vadd.f32 %v1610_v40, %v2541_v38  ;;  %v383_v45 = vpop.f32.mrb[7].mxu1  ;;  %v862_v40 = vsub.f32 %v2956_v42, %v2951_v29 }
 0x20e   :  { %v2580_v60 = vadd.f32 %v2541_v38, %v383_v45  ;;  %v1691_v45 = vld [vmem:[%s2861_s1 + $0x28] sm:$0xff] }
 0x20f   :  { %1334 = vrot.lane.b32.xlu1 %v496_v7, %s1726_s18  ;;  %v497_v47 = vsub.f32 %v1691_v45, %v2941_v50  ;;  %v1220_v7 = vsub.f32 %v2938_v20, %v2937_v1  ;;  %v1693_v1 = vld [vmem:[%s2861_s1 + $0x48] sm:$0xff]  ;;  %v1696_v45 = vld [vmem:[%s2861_s1 + $0x78] sm:$0xff] }
 0x210   :  { %v857_v20 = vsub.f32 %v1693_v1, %v2943_v43 }
 0x212   :  { %v1629_v27 = vpop.f32.mrb[8].mxu1 }
 0x213   :  { %1338 = vrot.lane.b32.xlu1 %v498_v59, %s1726_s18  ;;  %v2588_v55 = vpop.f32.mrb[9].mxu1  ;;  %v499_v59 = vsub.f32 %v1692_v28, %v2945_v3 }
 0x214   :  { %v2590_v10 = vpop.f32.mrb[10].mxu1 }
 0x215   :  { %v764_v32 = vpop.f32.mrb[11].mxu1 }
 0x217   :  { %1358 = vrot.lane.b32.xlu1 %v856_v23, %s1725_s13 }
 0x21a   :  { %v1633_v21 = vpop.f32.mrb[12].mxu1 }
 0x21b   :  { %1362 = vrot.lane.b32.xlu1 %v858_v16, %s1725_s13  ;;  %1328 = vrot.lane.b32.xlu0 %v493_v61, %s1726_s18  ;;  %v777_v58 = vpop.f32.mrb[13].mxu1  ;;  %v1224_v61 = vsub.f32 %v2950_v44, %v2949_v56  ;;  %v1695_v56 = vld [vmem:[%s2861_s1 + $0x68] sm:$0xff] }
 0x21c   :  { %v2603_v6 = vpop.f32.mrb[14].mxu1  ;;  %v861_v44 = vsub.f32 %v1695_v56, %v2941_v50 }
 0x21d   :  { %v2605_v4 = vpop.f32.mrb[15].mxu1 }
 0x21f   :  { %1366 = vrot.lane.b32.xlu1 %v860_v5, %s1725_s13  ;;  %1332 = vrot.lane.b32.xlu0 %v495_v0, %s1726_s18  ;;  %v859_v5 = vsub.f32 %v1694_v48, %v2939_v63  ;;  %v770_v0 = vadd.f32 %v1629_v27, %v2541_v38  ;;  %v863_v27 = vsub.f32 %v1696_v45, %v2945_v3 }
 0x223   :  { %1370 = vrot.lane.b32.xlu1 %v862_v40, %s1725_s13  ;;  %1336 = vrot.lane.b32.xlu0 %v497_v47, %s1726_s18  ;;  %v765_v40 = vadd.f32 %v2541_v38, %v764_v32  ;;  %v786_v47 = vadd.f32 %v1633_v21, %v2541_v38  ;;  %v778_v32 = vadd.f32 %v2541_v38, %v777_v58 }
 0x224   :  { %v762_v58 = vadd.f32 %v2541_v38, %v2588_v55  ;;  %v781_v55 = vadd.f32 %v2541_v38, %v2605_v4  ;;  %v1227_v4 = vsub.f32 %v2946_v52, %v2945_v3 }
 0x226   :  { %v1653_v18 = vpop.f32.mrb[16].mxu1 }
 0x227   :  { %1390 = vrot.lane.b32.xlu1 %v1220_v7, %s1727_s26  ;;  %1340 = vrot.lane.b32.xlu0 %v499_v59, %s1726_s18  ;;  %v1125_v23 = vpop.f32.mrb[17].mxu1  ;;  %v1697_v7 = vld [vmem:[%s2861_s1 + $0x88] sm:$0xff]  ;;  %v1698_v59 = vld [vmem:[%s2861_s1 + $0x98] sm:$0xff]  ;;  %v1134_v21 = vadd.f32 %v1653_v18, %v2541_v38 }
 0x228   :  { %v1654_v26 = vpop.f32.mrb[18].mxu1  ;;  %v1221_v28 = vsub.f32 %v1697_v7, %v2943_v43  ;;  %v1225_v43 = vsub.f32 %v2942_v31, %v2941_v50  ;;  %v1126_v1 = vadd.f32 %v2541_v38, %v1125_v23  ;;  %v789_v50 = vadd.f32 %v2603_v6, %v2541_v38 }
 0x229   :  { %v1128_v16 = vpop.f32.mrb[19].mxu1  ;;  %v1226_v23 = vsub.f32 %v2952_v53, %v2951_v29 }
 0x22a   :  { %v1129_v6 = vadd.f32 %v2541_v38, %v1128_v16 }
 0x22b   :  { %1394 = vrot.lane.b32.xlu1 %v1222_v35, %s1727_s26  ;;  %1360 = vrot.lane.b32.xlu0 %v857_v20, %s1725_s13  ;;  %v1223_v35 = vsub.f32 %v1698_v59, %v2939_v63  ;;  %v773_v63 = vadd.f32 %v2590_v10, %v2541_v38  ;;  %v1137_v10 = vadd.f32 %v1654_v26, %v2541_v38 }
 0x22e   :  { %v1657_v19 = vpop.f32.mrb[20].mxu1 }
 0x22f   :  { %1398 = vrot.lane.b32.xlu1 %v1224_v61, %s1727_s26  ;;  %1364 = vrot.lane.b32.xlu0 %v859_v5, %s1725_s13  ;;  %v1141_v14 = vpop.f32.mrb[21].mxu1  ;;  %v1150_v18 = vadd.f32 %v1657_v19, %v2541_v38 }
 0x230   :  { %v1658_v22 = vpop.f32.mrb[22].mxu1  ;;  %v1142_v31 = vadd.f32 %v2541_v38, %v1141_v14 }
 0x231   :  { %v1144_v42 = vpop.f32.mrb[23].mxu1  ;;  %v1153_v20 = vadd.f32 %v1658_v22, %v2541_v38 }
 0x232   :  { %v1145_v61 = vadd.f32 %v2541_v38, %v1144_v42 }
 0x233   :  { %1368 = vrot.lane.b32.xlu0 %v861_v44, %s1725_s13  ;;  %1240 = vrot.lane.b32.xlu1 %v770_v0, %s1728_s4 }
 0x237   :  { %1372 = vrot.lane.b32.xlu0 %v863_v27, %s1725_s13  ;;  %1238 = vrot.lane.b32.xlu1 %v765_v40, %s1728_s4  ;;  %s1729_s13 = smov 64  }
 0x23b   :  { %1392 = vrot.lane.b32.xlu0 %v1221_v28, %s1727_s26  ;;  %1248 = vrot.lane.b32.xlu1 %v786_v47, %s1728_s4 }
 0x23f   :  { %1396 = vrot.lane.b32.xlu0 %v1223_v35, %s1727_s26  ;;  %1244 = vrot.lane.b32.xlu1 %v778_v32, %s1728_s4 }
 0x243   :  { %1400 = vrot.lane.b32.xlu0 %v1225_v43, %s1727_s26  ;;  %1272 = vrot.lane.b32.xlu1 %v1134_v21, %s1729_s13 }
 0x247   :  { %1268 = vrot.lane.b32.xlu1 %v1126_v1, %s1729_s13  ;;  %1236 = vrot.lane.b32.xlu0 %v762_v58, %s1728_s4 }
 0x24b   :  { %1280 = vrot.lane.b32.xlu1 %v1150_v18, %s1729_s13  ;;  %1242 = vrot.lane.b32.xlu0 %v773_v63, %s1728_s4 }
 0x24f   :  { %1276 = vrot.lane.b32.xlu1 %v1142_v31, %s1729_s13  ;;  %1250 = vrot.lane.b32.xlu0 %v789_v50, %s1728_s4 }
 0x253   :  { %1402 = vrot.lane.b32.xlu1 %v1226_v23, %s1727_s26  ;;  %1246 = vrot.lane.b32.xlu0 %v781_v55, %s1728_s4 }
 0x257   :  { %1274 = vrot.lane.b32.xlu0 %v1137_v10, %s1729_s13 }
 0x25b   :  { %1270 = vrot.lane.b32.xlu0 %v1129_v6, %s1729_s13 }
 0x25f   :  { %1282 = vrot.lane.b32.xlu0 %v1153_v20, %s1729_s13 }
 0x263   :  { %1278 = vrot.lane.b32.xlu0 %v1145_v61, %s1729_s13 }
 0x267   :  { %1404 = vrot.lane.b32.xlu0 %v1227_v4, %s1727_s26  ;;  %s1730_s26 = smov [#allocation2]  }
 0x268   :  { %s1472_s27 = sshll.u32 %s1730_s26, 4  ;;  %s1473_s27 = int_to_ptr.vmem [resolvable:$true] %s1472_s27 }
 0x269   :  { %s1699_s28 = scalar_lea.vmem %s1473_s27, 1024  ;;  %p1704_p1 = scmp.lt.s32.totalorder %s1473_s27, %s1473_s27 }
 0x26a   :  { %p1700_p0 = scmp.ne.s32.totalorder %s1473_s27, %s1699_s28  ;;  %p1705_p2 = scmp.lt.s32.totalorder %s1699_s28, %s1699_s28 }
 0x26c   :  { %p1706_p3 = por %p1705_p2, %p1704_p1 }
 0x26e   :  { %p1707_p4 = pnand %p1706_p3, %p1700_p0 }
 0x277   :  { %v1198_v29 = vpop.xlane.xlu1 %1197 }
 0x27b   :  { %v2704_v53 = vpop.xlane.xlu1 %1206 }
 0x27f   :  { %v2706_v48 = vpop.xlane.xlu1 %1212 }
 0x283   :  { %v2708_v26 = vpop.xlane.xlu1 %1218 }
 0x286   :  { %v1201_v16 = vpop.xlane.xlu0 %1200 }
 0x287   :  { %v1327_v5 = vpop.permute.xlu1 %1326 }
 0x288   :  { %v1414_v47 = vsel %vm467_vm1, %v1327_v5, %v2507_v12 }
 0x28a   :  { %v1204_v19 = vpop.xlane.xlu0 %1203 }
 0x28b   :  { %v1331_v14 = vpop.permute.xlu1 %1330 }
 0x28c   :  { %v1416_v59 = vsel %vm467_vm1, %v1331_v14, %v2501_v37 }
 0x28e   :  { %v1210_v22 = vpop.xlane.xlu0 %1209 }
 0x28f   :  { %v1335_v0 = vpop.permute.xlu1 %1334 }
 0x290   :  { %v1418_v37 = vsel %vm467_vm1, %v1335_v0, %v2503_v62 }
 0x292   :  { %v2710_v38 = vpop.xlane.xlu0 %1215 }
 0x293   :  { %v2712_v42 = vpop.permute.xlu1 %1338 }
 0x296   :  { %v1329_v3 = vpop.permute.xlu0 %1328 }
 0x297   :  { %v1359_v52 = vpop.permute.xlu1 %1358  ;;  %v1415_v6 = vsel %vm467_vm1, %v1329_v3, %v2499_v30 }
 0x298   :  { %v1423_v28 = vsel %vm1422_vm2, %v1414_v47, %v1359_v52 }
 0x299   :  { %v1432_v35 = vsel %vm1431_vm3, %v1423_v28, %v2523_v33 }
 0x29a   :  { %v1333_v56 = vpop.permute.xlu0 %1332 }
 0x29b   :  { %v1363_v44 = vpop.permute.xlu1 %1362 }
 0x29c   :  { %v1425_v43 = vsel %vm1422_vm2, %v1416_v59, %v1363_v44 }
 0x29d   :  { %v1434_v33 = vsel %vm1431_vm3, %v1425_v43, %v2513_v39 }
 0x29e   :  { %v1337_v40 = vpop.permute.xlu0 %1336 }
 0x29f   :  { %v1367_v45 = vpop.permute.xlu1 %1366  ;;  %v1419_v0 = vsel %vm467_vm1, %v1337_v40, %v2515_v25 }
 0x2a0   :  { %v1427_v18 = vsel %vm1422_vm2, %v1418_v37, %v1367_v45 }
 0x2a1   :  { %v1436_v23 = vsel %vm1431_vm3, %v1427_v18, %v2517_v36  ;;  %v1417_v36 = vsel %vm467_vm1, %v1333_v56, %v2511_v11 }
 0x2a2   :  { %v2714_v27 = vpop.permute.xlu0 %1340 }
 0x2a3   :  { %v2718_v7 = vpop.permute.xlu1 %1370 }
 0x2a6   :  { %v1361_v32 = vpop.permute.xlu0 %1360 }
 0x2a7   :  { %v1391_v21 = vpop.permute.xlu1 %1390  ;;  %v1424_v61 = vsel %vm1422_vm2, %v1415_v6, %v1361_v32 }
 0x2a8   :  { %v1441_v12 = vsel %vm1440_vm4, %v1432_v35, %v1391_v21 }
 0x2a9   :  { %v1450_v58 = vsel %vm1449_vm5, %v1441_v12, %v1198_v29  ;;  %v1433_v29 = vsel %vm1431_vm3, %v1424_v61, %v2509_v2 }
 0x2aa   :  { %1459 = vst.msk [vmem:[%s2870_s10] sm:$0xff] %vm1458_vm6, %v1450_v58  ;;  %v1365_v1 = vpop.permute.xlu0 %1364 }
 0x2ab   :  { %v1395_v63 = vpop.permute.xlu1 %1394 }
 0x2ac   :  { %v1443_v50 = vsel %vm1440_vm4, %v1434_v33, %v1395_v63 }
 0x2ad   :  { %v1452_v31 = vsel %vm1449_vm5, %v1443_v50, %v1204_v19  ;;  %v1426_v19 = vsel %vm1422_vm2, %v1417_v36, %v1365_v1  ;;  %v1420_v1 = vsel %vm467_vm1, %v2712_v42, %v2505_v41 }
 0x2ae   :  { %1461 = vst.msk [vmem:[%s2870_s10 + $0x10] sm:$0xff] %vm1458_vm6, %v1452_v31  ;;  %v1369_v55 = vpop.permute.xlu0 %1368  ;;  %v1435_v11 = vsel %vm1431_vm3, %v1426_v19, %v2526_v17  ;;  %v1429_v33 = vsel %vm1422_vm2, %v1420_v1, %v2718_v7 }
 0x2af   :  { %v1399_v62 = vpop.permute.xlu1 %1398  ;;  %v1428_v3 = vsel %vm1422_vm2, %v1419_v0, %v1369_v55  ;;  %v1438_v41 = vsel %vm1431_vm3, %v1429_v33, %v2521_v15 }
 0x2b0   :  { %v1445_v10 = vsel %vm1440_vm4, %v1436_v23, %v1399_v62  ;;  %v1437_v25 = vsel %vm1431_vm3, %v1428_v3, %v2529_v54 }
 0x2b1   :  { %v1454_v39 = vsel %vm1449_vm5, %v1445_v10, %v1210_v22 }
 0x2b2   :  { %1463 = vst.msk [vmem:[%s2870_s10 + $0x20] sm:$0xff] %vm1458_vm6, %v1454_v39  ;;  %v2753_v20 = vpop.permute.xlu0 %1372 }
 0x2b3   :  { %v1241_v4 = vpop.permute.xlu1 %1240 }
 0x2b4   :  { %v1294_v47 = vsel %vm142_vm0, %v2544_v57, %v1241_v4 }
 0x2b6   :  { %v1393_v5 = vpop.permute.xlu0 %1392 }
 0x2b7   :  { %v1442_v30 = vsel %vm1440_vm4, %v1433_v29, %v1393_v5  ;;  %v1239_v14 = vpop.permute.xlu1 %1238 }
 0x2b8   :  { %v1451_v22 = vsel %vm1449_vm5, %v1442_v30, %v1201_v16  ;;  %v1293_v31 = vsel %vm142_vm0, %v2558_v24, %v1239_v14  ;;  %v1421_v24 = vsel %vm467_vm1, %v2714_v27, %v2519_v49 }
 0x2b9   :  { %1460 = vst.msk [vmem:[%s2870_s10 + $0x8] sm:$0xff] %vm1458_vm6, %v1451_v22  ;;  %v1430_v39 = vsel %vm1422_vm2, %v1421_v24, %v2753_v20 }
 0x2ba   :  { %v1397_v2 = vpop.permute.xlu0 %1396 }
 0x2bb   :  { %v1444_v52 = vsel %vm1440_vm4, %v1435_v11, %v1397_v2  ;;  %v1249_v56 = vpop.permute.xlu1 %1248 }
 0x2bc   :  { %v1453_v16 = vsel %vm1449_vm5, %v1444_v52, %v2704_v53  ;;  %v1298_v43 = vsel %vm142_vm0, %v2566_v13, %v1249_v56 }
 0x2bd   :  { %1462 = vst.msk [vmem:[%s2870_s10 + $0x18] sm:$0xff] %vm1458_vm6, %v1453_v16 }
 0x2be   :  { %v1401_v44 = vpop.permute.xlu0 %1400 }
 0x2bf   :  { %v1446_v17 = vsel %vm1440_vm4, %v1437_v25, %v1401_v44  ;;  %v1245_v40 = vpop.permute.xlu1 %1244 }
 0x2c0   :  { %v1455_v45 = vsel %vm1449_vm5, %v1446_v17, %v2706_v48 }
 0x2c1   :  { %1464 = vst.msk [vmem:[%s2870_s10 + $0x28] sm:$0xff] %vm1458_vm6, %v1455_v45 }
 0x2c2   :  { %v1237_v53 = vpop.permute.xlu0 %1236 }
 0x2c3   :  { %v1273_v28 = vpop.permute.xlu1 %1272  ;;  %v1292_v48 = vsel %vm142_vm0, %v2547_v9, %v1237_v53  ;;  %v1296_v9 = vsel %vm142_vm0, %v2570_v46, %v1245_v40 }
 0x2c4   :  { %v1303_v54 = vsel %vm1300_vm7, %v1294_v47, %v1273_v28 }
 0x2c5   :  { %1312 = vst.msk [vmem:[#allocation2 + $0x10] sm:$0xff] %vm1309_vm8, %v1303_v54 }
 0x2c6   :  { %v1243_v32 = vpop.permute.xlu0 %1242 }
 0x2c7   :  { %v1269_v59 = vpop.permute.xlu1 %1268  ;;  %v1295_v13 = vsel %vm142_vm0, %v2551_v34, %v1243_v32 }
 0x2c8   :  { %v1301_v35 = vsel %vm1300_vm7, %v1292_v48, %v1269_v59 }
 0x2c9   :  { %1310 = vst.msk [vmem:[#allocation2] sm:$0xff] %vm1309_vm8, %v1301_v35 }
 0x2ca   :  { %v1251_v21 = vpop.permute.xlu0 %1250 }
 0x2cb   :  { %v1281_v12 = vpop.permute.xlu1 %1280  ;;  %v1299_v15 = vsel %vm142_vm0, %v2573_v8, %v1251_v21 }
 0x2cc   :  { %v1307_v57 = vsel %vm1300_vm7, %v1298_v43, %v1281_v12 }
 0x2cd   :  { %1316 = vst.msk [vmem:[#allocation2 + $0x30] sm:$0xff] %vm1309_vm8, %v1307_v57 }
 0x2ce   :  { %v1247_v58 = vpop.permute.xlu0 %1246 }
 0x2cf   :  { %v1277_v37 = vpop.permute.xlu1 %1276  ;;  %v1297_v62 = vsel %vm142_vm0, %v2580_v60, %v1247_v58 }
 0x2d0   :  { %v1305_v63 = vsel %vm1300_vm7, %v1296_v9, %v1277_v37 }
 0x2d1   :  { %1314 = vst.msk [vmem:[#allocation2 + $0x20] sm:$0xff] %vm1309_vm8, %v1305_v63 }
 0x2d2   :  { %v1275_v18 = vpop.permute.xlu0 %1274 }
 0x2d3   :  { %v1304_v50 = vsel %vm1300_vm7, %v1295_v13, %v1275_v18  ;;  %v1403_v42 = vpop.permute.xlu1 %1402 }
 0x2d4   :  { %1313 = vst.msk [vmem:[#allocation2 + $0x18] sm:$0xff] %vm1309_vm8, %v1304_v50  ;;  %v1447_v46 = vsel %vm1440_vm4, %v1438_v41, %v1403_v42 }
 0x2d5   :  { %v1456_v7 = vsel %vm1449_vm5, %v1447_v46, %v2710_v38 }
 0x2d6   :  { %1465 = vst.msk [vmem:[%s2870_s10 + $0x30] sm:$0xff] %vm1458_vm6, %v1456_v7  ;;  %v1271_v34 = vpop.permute.xlu0 %1270 }
 0x2d7   :  { %v1302_v55 = vsel %vm1300_vm7, %v1293_v31, %v1271_v34 }
 0x2d8   :  { %1311 = vst.msk [vmem:[#allocation2 + $0x8] sm:$0xff] %vm1309_vm8, %v1302_v55 }
 0x2da   :  { %v1283_v23 = vpop.permute.xlu0 %1282 }
 0x2db   :  { %v1308_v38 = vsel %vm1300_vm7, %v1299_v15, %v1283_v23 }
 0x2dc   :  { %1317 = vst.msk [vmem:[#allocation2 + $0x38] sm:$0xff] %vm1309_vm8, %v1308_v38 }
 0x2de   :  { %v1279_v10 = vpop.permute.xlu0 %1278 }
 0x2df   :  { %v1306_v8 = vsel %vm1300_vm7, %v1297_v62, %v1279_v10 }
 0x2e0   :  { %1315 = vst.msk [vmem:[#allocation2 + $0x28] sm:$0xff] %vm1309_vm8, %v1306_v8 }
 0x2e1   :  { %1710 = shalt.err (!%p1707_p4)
}
 0x2e2   :  { %s1711_s30 = scalar_lea.hbm %s2869_s9, 1024 }
 0x2e3   :  { %p1712_p5 = scmp.ne.s32.totalorder %s2869_s9, %s1711_s30  ;;  %p1715_p6 = scmp.lt.u32.totalorder %s1711_s30, %s2869_s9 }
 0x2e5   :  { %p1717_p7 = pnand %p1715_p6, %p1712_p5 }
 0x2e7   :  { %1720 = shalt.err (!%p1717_p7)
}
 0x2e8   :  { %s1731_s11 = smov 128   ;;  %s1732_s8 = smov 8   ;;  %v1439_v49 = vsel %vm1431_vm3, %v1430_v39, %v2532_v51  ;;  %v1405_v60 = vpop.permute.xlu0 %1404 }
 0x2e9   :  { %1478 = dma.vmem_to_hbm [thread:$0]  %s1473_s27, 1024, %s2869_s9, [#allocation3], %s1731_s11, %s1731_s11, %s1732_s8   ;;  %v1448_v27 = vsel %vm1440_vm4, %v1439_v49, %v1405_v60 }
 0x2ea   :  { %v1457_v6 = vsel %vm1449_vm5, %v1448_v27, %v2708_v26 }
 0x2eb   :  { %1466 = vst.msk [vmem:[%s2870_s10 + $0x38] sm:$0xff] %vm1458_vm6, %v1457_v6 }
 0x2ec   :  { %1721 = dma.done.wait [#allocation3], 1024  }
 0x2ed   :  { %1722 = vsyncadd [#allocation3], 4294966272 }
 0x2ee   :  { %1486 = vsyncpa [#allocation3], 1 }

</bundles_post_ra>
